<compile_context>
chip_gen: v5e
topology: v5e:2x2
jax: 0.10.0
libtpu: 0.0.40
codegen_flags: <defaults>
</compile_context>

<pallas_src>
import functools

import jax
import jax.numpy as jnp
from jax import lax
from jax.experimental import pallas as pl
from jax.experimental.pallas import tpu as pltpu

_SUBLANE = 8  # batch is padded to one full sublane group


def _encoder_kernel(x_ref, wih0_ref, wihs_ref, whhs_ref, b_ref,
                    h_out_ref, c_out_ref,
                    gates_scr, y_scr, *, seq_len, batch_pad, unroll):
    """Fused multi-layer LSTM forward over the whole sequence.

    x_ref     : (T*Bp, D_in)        time-major flattened, batch-padded input
    wih0_ref  : (D_in, 4H)          layer-0 input->hidden weights (transposed)
    wihs_ref  : (max(L-1,1), H, 4H) layer>=1 input->hidden weights (transposed)
    whhs_ref  : (L, H, 4H)          hidden->hidden weights (transposed)
    b_ref     : (L, 1, 4H)          per-layer combined bias (b_ih + b_hh)
    h_out_ref : (L, Bp, H)          final hidden states (padded batch)
    c_out_ref : (L, Bp, H)          final cell states (padded batch)
    gates_scr : (T, Bp, 4H) f32     scratch: precomputed x@W_ih + b for a layer
    y_scr     : (T, Bp, H)  f32     scratch: this layer's per-step outputs
    """
    T = seq_len
    Bp = batch_pad
    n_layers = whhs_ref.shape[0]
    H = whhs_ref.shape[1]

    def run_layer_recurrence(layer, write_y):
        # Recurrent weights loaded once per layer (static layer index).
        w_hh = whhs_ref[layer]                                     # (H, 4H)

        def step(t, carry):
            h, c = carry                                           # (Bp, H) f32 vregs
            # Whole-tile aligned load: gates_scr[t] is one (Bp, 4H) = (8, 128) tile.
            gates = gates_scr[t] + jnp.dot(
                h, w_hh, preferred_element_type=jnp.float32)       # (Bp, 4H)

            # Two full-width EUP pushes instead of four narrow ones:
            #   sigmoid(x) == 0.5 * tanh(0.5 x) + 0.5
            sig = jnp.tanh(gates * 0.5) * 0.5 + 0.5
            tnh = jnp.tanh(gates)
            i_g = sig[:, 0 * H:1 * H]
            f_g = sig[:, 1 * H:2 * H]
            o_g = sig[:, 3 * H:4 * H]
            g_g = tnh[:, 2 * H:3 * H]

            c_new = f_g * c + i_g * g_g
            h_new = o_g * jnp.tanh(c_new)

            if write_y:  # static: last layer's per-step outputs are not needed
                y_scr[t] = h_new
            return (h_new, c_new)

        init = (jnp.zeros((Bp, H), jnp.float32),
                jnp.zeros((Bp, H), jnp.float32))
        h_T, c_T = lax.fori_loop(0, T, step, init, unroll=unroll)

        h_out_ref[layer] = h_T.astype(h_out_ref.dtype)
        c_out_ref[layer] = c_T.astype(c_out_ref.dtype)

    # ---- Layer 0: one big (T*Bp, D_in) @ (D_in, 4H) MXU matmul + bias ----
    g0 = jnp.dot(x_ref[...], wih0_ref[...],
                 preferred_element_type=jnp.float32) + b_ref[0]
    gates_scr[...] = g0.reshape(T, Bp, 4 * H)   # sublane-aligned split (Bp == 8)
    run_layer_recurrence(0, write_y=(n_layers > 1))

    # ---- Layers 1..L-1: re-project previous layer's outputs in one matmul ----
    for layer in range(1, n_layers):
        y2d = y_scr[...].reshape(T * Bp, H)
        gl = jnp.dot(y2d, wihs_ref[layer - 1],
                     preferred_element_type=jnp.float32) + b_ref[layer]
        gates_scr[...] = gl.reshape(T, Bp, 4 * H)
        run_layer_recurrence(layer, write_y=(layer + 1 < n_layers))


class EncoderPallas:
    """JAX/Pallas equivalent of the PyTorch Encoder module (eval mode)."""

    def __init__(self, input_size, hidden_dim, n_layers, batch_first, dropout,
                 key=jax.random.PRNGKey(0)):
        self.input_size = input_size
        self.hidden_dim = hidden_dim
        self.n_layers = n_layers
        self.batch_first = batch_first

        # PyTorch LSTM parameter shapes: weight_ih_l{k}: (4H, D_in_k),
        # weight_hh_l{k}: (4H, H), biases (4H,), Uniform(-1/sqrt(H), 1/sqrt(H)).
        bound = 1.0 / float(hidden_dim) ** 0.5
        layers = []
        for layer in range(n_layers):
            d_in = input_size if layer == 0 else hidden_dim
            key, k1, k2, k3, k4 = jax.random.split(key, 5)
            w_ih = jax.random.uniform(k1, (4 * hidden_dim, d_in),
                                      jnp.float32, -bound, bound)
            w_hh = jax.random.uniform(k2, (4 * hidden_dim, hidden_dim),
                                      jnp.float32, -bound, bound)
            b_ih = jax.random.uniform(k3, (4 * hidden_dim,),
                                      jnp.float32, -bound, bound)
            b_hh = jax.random.uniform(k4, (4 * hidden_dim,),
                                      jnp.float32, -bound, bound)
            # Pre-transpose for the kernel's (rows, D) @ (D, 4H) hot path.
            layers.append((
                jnp.asarray(w_ih.T),                        # (D_in, 4H)
                jnp.asarray(w_hh.T),                        # (H, 4H)
                (b_ih + b_hh).reshape(1, 4 * hidden_dim),   # (1, 4H)
            ))
        self.params = layers  # per-layer tuples, used by the pure-JAX reference

        # Stacked layout consumed by the fused kernel.
        self.w_ih0 = layers[0][0]                                       # (D_in, 4H)
        if n_layers > 1:
            self.w_ih_rest = jnp.stack(
                [layers[l][0] for l in range(1, n_layers)], axis=0)     # (L-1, H, 4H)
        else:
            # Dummy (never read) so the kernel signature stays fixed.
            self.w_ih_rest = jnp.zeros((1, hidden_dim, 4 * hidden_dim),
                                       jnp.float32)
        self.w_hh_all = jnp.stack(
            [layers[l][1] for l in range(n_layers)], axis=0)            # (L, H, 4H)
        self.b_all = jnp.stack(
            [layers[l][2] for l in range(n_layers)], axis=0)            # (L, 1, 4H)

    def __call__(self, src):
        # src: (B, T, D_in) if batch_first else (T, B, D_in)
        if self.batch_first:
            x_tm = jnp.transpose(src, (1, 0, 2))     # time-major (T, B, D_in)
        else:
            x_tm = src
        T, B, D = x_tm.shape
        H = self.hidden_dim
        L = self.n_layers

        # Pad batch to a full sublane group so every per-step access in the
        # recurrence is an aligned, unmasked whole-tile load/store.
        Bp = max(_SUBLANE, ((B + _SUBLANE - 1) // _SUBLANE) * _SUBLANE)
        if Bp != B:
            x_tm = jnp.pad(x_tm, ((0, 0), (0, Bp - B), (0, 0)))
        x2d = x_tm.reshape(T * Bp, D)                # row = t*Bp + b

        # Right-sized VMEM limit: inputs + weights + outputs + scratch, with
        # generous headroom for double-buffering / internal scratch.
        est_bytes = 4 * (
            T * Bp * D                       # x2d
            + D * 4 * H                      # w_ih0
            + max(L - 1, 1) * H * 4 * H      # w_ih_rest
            + L * H * 4 * H                  # w_hh_all
            + L * 4 * H                      # b_all
            + 2 * L * Bp * H                 # h/c outputs
            + T * Bp * 4 * H                 # gates_scr
            + T * Bp * H)                    # y_scr
        vmem_limit = max(4 * 1024 * 1024, 4 * est_bytes)

        kernel = functools.partial(_encoder_kernel, seq_len=T, batch_pad=Bp,
                                   unroll=min(T, 8))
        hidden, cell = pl.pallas_call(
            kernel,
            out_shape=(jax.ShapeDtypeStruct((L, Bp, H), jnp.float32),
                       jax.ShapeDtypeStruct((L, Bp, H), jnp.float32)),
            in_specs=[pl.BlockSpec(memory_space=pltpu.VMEM)] * 5,
            out_specs=(pl.BlockSpec(memory_space=pltpu.VMEM),
                       pl.BlockSpec(memory_space=pltpu.VMEM)),
            scratch_shapes=[
                pltpu.VMEM((T, Bp, 4 * H), jnp.float32),   # per-layer gate staging
                pltpu.VMEM((T, Bp, H), jnp.float32),       # inter-layer activations
            ],
            compiler_params=pltpu.CompilerParams(
                vmem_limit_bytes=int(vmem_limit)),
        )(x2d, self.w_ih0, self.w_ih_rest, self.w_hh_all, self.b_all)

        # Drop the batch padding.
        return hidden[:, :B, :], cell[:, :B, :]


def _reference_lstm(src, params, batch_first):
    """Pure-JAX reference of the same LSTM for correctness checking."""
    x = jnp.transpose(src, (1, 0, 2)) if batch_first else src  # (T, B, D)
    T, B, _ = x.shape
    hiddens, cells = [], []
    for (w_ih_t, w_hh_t, b) in params:
        H = w_hh_t.shape[0]
        h = jnp.zeros((B, H), jnp.float32)
        c = jnp.zeros((B, H), jnp.float32)
        ys = []
        for t in range(T):
            gates = x[t] @ w_ih_t + h @ w_hh_t + b
            i_g = jax.nn.sigmoid(gates[:, 0 * H:1 * H])
            f_g = jax.nn.sigmoid(gates[:, 1 * H:2 * H])
            g_g = jnp.tanh(gates[:, 2 * H:3 * H])
            o_g = jax.nn.sigmoid(gates[:, 3 * H:4 * H])
            c = f_g * c + i_g * g_g
            h = o_g * jnp.tanh(c)
            ys.append(h)
        x = jnp.stack(ys, axis=0)
        hiddens.append(h)
        cells.append(c)
    return jnp.stack(hiddens, 0), jnp.stack(cells, 0)


if __name__ == "__main__":
    # Small, module-consistent shapes.
    batch = 2
    seq = 8
    input_size = 16
    hidden_dim = 32
    n_layers = 2
    dropout = 0.0
    batch_first = True

    key = jax.random.PRNGKey(0)
    k_param, k_data = jax.random.split(key)

    enc = EncoderPallas(input_size, hidden_dim, n_layers, batch_first, dropout,
                        key=k_param)

    src = jax.random.normal(k_data, (batch, seq, input_size), jnp.float32)

    hidden, cell = enc(src)
    hidden = jax.block_until_ready(hidden)
    cell = jax.block_until_ready(cell)

    assert hidden.shape == (n_layers, batch, hidden_dim)
    assert cell.shape == (n_layers, batch, hidden_dim)

    # Cross-check against a pure-JAX reference implementation.
    h_ref, c_ref = _reference_lstm(src, enc.params, batch_first)
    assert jnp.allclose(hidden, h_ref, atol=1e-4, rtol=1e-4), (
        float(jnp.max(jnp.abs(hidden - h_ref))))
    assert jnp.allclose(cell, c_ref, atol=1e-4, rtol=1e-4), (
        float(jnp.max(jnp.abs(cell - c_ref))))

    print("KERNEL_OK")
</pallas_src>

<mosaic_0001>
module attributes {stable_mosaic.version = 11 : i64} {
  func.func @_encoder_kernel(%arg0: memref<64x16xf32, #tpu.memory_space<vmem>>, %arg1: memref<16x128xf32, #tpu.memory_space<vmem>>, %arg2: memref<1x32x128xf32, #tpu.memory_space<vmem>>, %arg3: memref<2x32x128xf32, #tpu.memory_space<vmem>>, %arg4: memref<2x1x128xf32, #tpu.memory_space<vmem>>, %arg5: memref<2x8x32xf32, #tpu.memory_space<vmem>>, %arg6: memref<2x8x32xf32, #tpu.memory_space<vmem>>, %arg7: memref<8x8x128xf32, #tpu.memory_space<vmem>>, %arg8: memref<8x8x32xf32, #tpu.memory_space<vmem>>) attributes {dimension_semantics = [], scalar_prefetch = 0 : i64, scratch_operands = 2 : i64, tpu.core_type = #tpu.core_type<tc>} {
    %c0 = arith.constant 0 : index
    %c0_0 = arith.constant 0 : index
    %0 = vector.load %arg0[%c0, %c0_0] : memref<64x16xf32, #tpu.memory_space<vmem>>, vector<64x16xf32>
    %c0_1 = arith.constant 0 : index
    %c0_2 = arith.constant 0 : index
    %1 = vector.load %arg1[%c0_1, %c0_2] : memref<16x128xf32, #tpu.memory_space<vmem>>, vector<16x128xf32>
    %cst = arith.constant dense<0.000000e+00> : vector<64x128xf32>
    %2 = tpu.matmul %0, %1, %cst {dimension_numbers = #tpu.dot_dimension_numbers<[1], [0], [0], [1], [0, 0, 1, 1], [], []>} : vector<64x16xf32>, vector<16x128xf32>, vector<64x128xf32> -> vector<64x128xf32>
    %c0_3 = arith.constant 0 : index
    %c0_4 = arith.constant 0 : index
    %c0_5 = arith.constant 0 : index
    %3 = vector.load %arg4[%c0_3, %c0_4, %c0_5] : memref<2x1x128xf32, #tpu.memory_space<vmem>>, vector<1x1x128xf32>
    %4 = vector.shape_cast %3 : vector<1x1x128xf32> to vector<1x128xf32>
    %5 = vector.broadcast %4 : vector<1x128xf32> to vector<64x128xf32>
    %6 = arith.addf %2, %5 : vector<64x128xf32>
    %7 = vector.shape_cast %6 : vector<64x128xf32> to vector<8x8x128xf32>
    %c0_6 = arith.constant 0 : index
    %c0_7 = arith.constant 0 : index
    %c0_8 = arith.constant 0 : index
    %8 = vector.load %arg7[%c0_6, %c0_7, %c0_8] : memref<8x8x128xf32, #tpu.memory_space<vmem>>, vector<8x8x128xf32>
    tpu.vector_store %arg7[%c0_6, %c0_7, %c0_8], %7 {strides = array<i32>} : memref<8x8x128xf32, #tpu.memory_space<vmem>>, vector<8x8x128xf32>,
    %c0_9 = arith.constant 0 : index
    %c0_10 = arith.constant 0 : index
    %c0_11 = arith.constant 0 : index
    %9 = vector.load %arg3[%c0_9, %c0_10, %c0_11] : memref<2x32x128xf32, #tpu.memory_space<vmem>>, vector<1x32x128xf32>
    %10 = vector.shape_cast %9 : vector<1x32x128xf32> to vector<32x128xf32>
    %cst_12 = arith.constant 0.000000e+00 : f32
    %11 = vector.broadcast %cst_12 : f32 to vector<8x32xf32>
    %cst_13 = arith.constant 0.000000e+00 : f32
    %12 = vector.broadcast %cst_13 : f32 to vector<8x32xf32>
    %c0_i32 = arith.constant 0 : i32
    %13 = arith.index_cast %c0_i32 : i32 to index
    %c0_14 = arith.constant 0 : index
    %c0_15 = arith.constant 0 : index
    %14 = vector.load %arg7[%13, %c0_14, %c0_15] : memref<8x8x128xf32, #tpu.memory_space<vmem>>, vector<1x8x128xf32>
    %15 = vector.shape_cast %14 : vector<1x8x128xf32> to vector<8x128xf32>
    %cst_16 = arith.constant dense<0.000000e+00> : vector<8x128xf32>
    %16 = tpu.matmul %11, %10, %cst_16 {dimension_numbers = #tpu.dot_dimension_numbers<[1], [0], [0], [1], [0, 0, 1, 1], [], []>} : vector<8x32xf32>, vector<32x128xf32>, vector<8x128xf32> -> vector<8x128xf32>
    %17 = arith.addf %15, %16 : vector<8x128xf32>
    %cst_17 = arith.constant 5.000000e-01 : f32
    %18 = vector.broadcast %cst_17 : f32 to vector<8x128xf32>
    %19 = arith.mulf %17, %18 : vector<8x128xf32>
    %20 = math.tanh %19 : vector<8x128xf32>
    %cst_18 = arith.constant 5.000000e-01 : f32
    %21 = vector.broadcast %cst_18 : f32 to vector<8x128xf32>
    %22 = arith.mulf %20, %21 : vector<8x128xf32>
    %cst_19 = arith.constant 5.000000e-01 : f32
    %23 = vector.broadcast %cst_19 : f32 to vector<8x128xf32>
    %24 = arith.addf %22, %23 : vector<8x128xf32>
    %25 = math.tanh %17 : vector<8x128xf32>
    %26 = vector.extract_strided_slice %24 {offsets = [0, 0], sizes = [8, 32], strides = [1, 1]} : vector<8x128xf32> to vector<8x32xf32>
    %27 = vector.extract_strided_slice %24 {offsets = [0, 32], sizes = [8, 32], strides = [1, 1]} : vector<8x128xf32> to vector<8x32xf32>
    %28 = vector.extract_strided_slice %24 {offsets = [0, 96], sizes = [8, 32], strides = [1, 1]} : vector<8x128xf32> to vector<8x32xf32>
    %29 = vector.extract_strided_slice %25 {offsets = [0, 64], sizes = [8, 32], strides = [1, 1]} : vector<8x128xf32> to vector<8x32xf32>
    %30 = arith.mulf %27, %12 : vector<8x32xf32>
    %31 = arith.mulf %26, %29 : vector<8x32xf32>
    %32 = arith.addf %30, %31 : vector<8x32xf32>
    %33 = math.tanh %32 : vector<8x32xf32>
    %34 = arith.mulf %28, %33 : vector<8x32xf32>
    %35 = arith.index_cast %c0_i32 : i32 to index
    %c0_20 = arith.constant 0 : index
    %c0_21 = arith.constant 0 : index
    %36 = vector.load %arg8[%35, %c0_20, %c0_21] : memref<8x8x32xf32, #tpu.memory_space<vmem>>, vector<1x8x32xf32>
    %37 = vector.shape_cast %36 : vector<1x8x32xf32> to vector<8x32xf32>
    %38 = vector.shape_cast %34 : vector<8x32xf32> to vector<1x8x32xf32>
    tpu.vector_store %arg8[%35, %c0_20, %c0_21], %38 {strides = array<i32>} : memref<8x8x32xf32, #tpu.memory_space<vmem>>, vector<1x8x32xf32>,
    %c1_i32 = arith.constant 1 : i32
    %39 = arith.index_cast %c1_i32 : i32 to index
    %c0_22 = arith.constant 0 : index
    %c0_23 = arith.constant 0 : index
    %40 = vector.load %arg7[%39, %c0_22, %c0_23] : memref<8x8x128xf32, #tpu.memory_space<vmem>>, vector<1x8x128xf32>
    %41 = vector.shape_cast %40 : vector<1x8x128xf32> to vector<8x128xf32>
    %cst_24 = arith.constant dense<0.000000e+00> : vector<8x128xf32>
    %42 = tpu.matmul %34, %10, %cst_24 {dimension_numbers = #tpu.dot_dimension_numbers<[1], [0], [0], [1], [0, 0, 1, 1], [], []>} : vector<8x32xf32>, vector<32x128xf32>, vector<8x128xf32> -> vector<8x128xf32>
    %43 = arith.addf %41, %42 : vector<8x128xf32>
    %cst_25 = arith.constant 5.000000e-01 : f32
    %44 = vector.broadcast %cst_25 : f32 to vector<8x128xf32>
    %45 = arith.mulf %43, %44 : vector<8x128xf32>
    %46 = math.tanh %45 : vector<8x128xf32>
    %cst_26 = arith.constant 5.000000e-01 : f32
    %47 = vector.broadcast %cst_26 : f32 to vector<8x128xf32>
    %48 = arith.mulf %46, %47 : vector<8x128xf32>
    %cst_27 = arith.constant 5.000000e-01 : f32
    %49 = vector.broadcast %cst_27 : f32 to vector<8x128xf32>
    %50 = arith.addf %48, %49 : vector<8x128xf32>
    %51 = math.tanh %43 : vector<8x128xf32>
    %52 = vector.extract_strided_slice %50 {offsets = [0, 0], sizes = [8, 32], strides = [1, 1]} : vector<8x128xf32> to vector<8x32xf32>
    %53 = vector.extract_strided_slice %50 {offsets = [0, 32], sizes = [8, 32], strides = [1, 1]} : vector<8x128xf32> to vector<8x32xf32>
    %54 = vector.extract_strided_slice %50 {offsets = [0, 96], sizes = [8, 32], strides = [1, 1]} : vector<8x128xf32> to vector<8x32xf32>
    %55 = vector.extract_strided_slice %51 {offsets = [0, 64], sizes = [8, 32], strides = [1, 1]} : vector<8x128xf32> to vector<8x32xf32>
    %56 = arith.mulf %53, %32 : vector<8x32xf32>
    %57 = arith.mulf %52, %55 : vector<8x32xf32>
    %58 = arith.addf %56, %57 : vector<8x32xf32>
    %59 = math.tanh %58 : vector<8x32xf32>
    %60 = arith.mulf %54, %59 : vector<8x32xf32>
    %61 = arith.index_cast %c1_i32 : i32 to index
    %c0_28 = arith.constant 0 : index
    %c0_29 = arith.constant 0 : index
    %62 = vector.load %arg8[%61, %c0_28, %c0_29] : memref<8x8x32xf32, #tpu.memory_space<vmem>>, vector<1x8x32xf32>
    %63 = vector.shape_cast %62 : vector<1x8x32xf32> to vector<8x32xf32>
    %64 = vector.shape_cast %60 : vector<8x32xf32> to vector<1x8x32xf32>
    tpu.vector_store %arg8[%61, %c0_28, %c0_29], %64 {strides = array<i32>} : memref<8x8x32xf32, #tpu.memory_space<vmem>>, vector<1x8x32xf32>,
    %c2_i32 = arith.constant 2 : i32
    %65 = arith.index_cast %c2_i32 : i32 to index
    %c0_30 = arith.constant 0 : index
    %c0_31 = arith.constant 0 : index
    %66 = vector.load %arg7[%65, %c0_30, %c0_31] : memref<8x8x128xf32, #tpu.memory_space<vmem>>, vector<1x8x128xf32>
    %67 = vector.shape_cast %66 : vector<1x8x128xf32> to vector<8x128xf32>
    %cst_32 = arith.constant dense<0.000000e+00> : vector<8x128xf32>
    %68 = tpu.matmul %60, %10, %cst_32 {dimension_numbers = #tpu.dot_dimension_numbers<[1], [0], [0], [1], [0, 0, 1, 1], [], []>} : vector<8x32xf32>, vector<32x128xf32>, vector<8x128xf32> -> vector<8x128xf32>
    %69 = arith.addf %67, %68 : vector<8x128xf32>
    %cst_33 = arith.constant 5.000000e-01 : f32
    %70 = vector.broadcast %cst_33 : f32 to vector<8x128xf32>
    %71 = arith.mulf %69, %70 : vector<8x128xf32>
    %72 = math.tanh %71 : vector<8x128xf32>
    %cst_34 = arith.constant 5.000000e-01 : f32
    %73 = vector.broadcast %cst_34 : f32 to vector<8x128xf32>
    %74 = arith.mulf %72, %73 : vector<8x128xf32>
    %cst_35 = arith.constant 5.000000e-01 : f32
    %75 = vector.broadcast %cst_35 : f32 to vector<8x128xf32>
    %76 = arith.addf %74, %75 : vector<8x128xf32>
    %77 = math.tanh %69 : vector<8x128xf32>
    %78 = vector.extract_strided_slice %76 {offsets = [0, 0], sizes = [8, 32], strides = [1, 1]} : vector<8x128xf32> to vector<8x32xf32>
    %79 = vector.extract_strided_slice %76 {offsets = [0, 32], sizes = [8, 32], strides = [1, 1]} : vector<8x128xf32> to vector<8x32xf32>
    %80 = vector.extract_strided_slice %76 {offsets = [0, 96], sizes = [8, 32], strides = [1, 1]} : vector<8x128xf32> to vector<8x32xf32>
    %81 = vector.extract_strided_slice %77 {offsets = [0, 64], sizes = [8, 32], strides = [1, 1]} : vector<8x128xf32> to vector<8x32xf32>
    %82 = arith.mulf %79, %58 : vector<8x32xf32>
    %83 = arith.mulf %78, %81 : vector<8x32xf32>
    %84 = arith.addf %82, %83 : vector<8x32xf32>
    %85 = math.tanh %84 : vector<8x32xf32>
    %86 = arith.mulf %80, %85 : vector<8x32xf32>
    %87 = arith.index_cast %c2_i32 : i32 to index
    %c0_36 = arith.constant 0 : index
    %c0_37 = arith.constant 0 : index
    %88 = vector.load %arg8[%87, %c0_36, %c0_37] : memref<8x8x32xf32, #tpu.memory_space<vmem>>, vector<1x8x32xf32>
    %89 = vector.shape_cast %88 : vector<1x8x32xf32> to vector<8x32xf32>
    %90 = vector.shape_cast %86 : vector<8x32xf32> to vector<1x8x32xf32>
    tpu.vector_store %arg8[%87, %c0_36, %c0_37], %90 {strides = array<i32>} : memref<8x8x32xf32, #tpu.memory_space<vmem>>, vector<1x8x32xf32>,
    %c3_i32 = arith.constant 3 : i32
    %91 = arith.index_cast %c3_i32 : i32 to index
    %c0_38 = arith.constant 0 : index
    %c0_39 = arith.constant 0 : index
    %92 = vector.load %arg7[%91, %c0_38, %c0_39] : memref<8x8x128xf32, #tpu.memory_space<vmem>>, vector<1x8x128xf32>
    %93 = vector.shape_cast %92 : vector<1x8x128xf32> to vector<8x128xf32>
    %cst_40 = arith.constant dense<0.000000e+00> : vector<8x128xf32>
    %94 = tpu.matmul %86, %10, %cst_40 {dimension_numbers = #tpu.dot_dimension_numbers<[1], [0], [0], [1], [0, 0, 1, 1], [], []>} : vector<8x32xf32>, vector<32x128xf32>, vector<8x128xf32> -> vector<8x128xf32>
    %95 = arith.addf %93, %94 : vector<8x128xf32>
    %cst_41 = arith.constant 5.000000e-01 : f32
    %96 = vector.broadcast %cst_41 : f32 to vector<8x128xf32>
    %97 = arith.mulf %95, %96 : vector<8x128xf32>
    %98 = math.tanh %97 : vector<8x128xf32>
    %cst_42 = arith.constant 5.000000e-01 : f32
    %99 = vector.broadcast %cst_42 : f32 to vector<8x128xf32>
    %100 = arith.mulf %98, %99 : vector<8x128xf32>
    %cst_43 = arith.constant 5.000000e-01 : f32
    %101 = vector.broadcast %cst_43 : f32 to vector<8x128xf32>
    %102 = arith.addf %100, %101 : vector<8x128xf32>
    %103 = math.tanh %95 : vector<8x128xf32>
    %104 = vector.extract_strided_slice %102 {offsets = [0, 0], sizes = [8, 32], strides = [1, 1]} : vector<8x128xf32> to vector<8x32xf32>
    %105 = vector.extract_strided_slice %102 {offsets = [0, 32], sizes = [8, 32], strides = [1, 1]} : vector<8x128xf32> to vector<8x32xf32>
    %106 = vector.extract_strided_slice %102 {offsets = [0, 96], sizes = [8, 32], strides = [1, 1]} : vector<8x128xf32> to vector<8x32xf32>
    %107 = vector.extract_strided_slice %103 {offsets = [0, 64], sizes = [8, 32], strides = [1, 1]} : vector<8x128xf32> to vector<8x32xf32>
    %108 = arith.mulf %105, %84 : vector<8x32xf32>
    %109 = arith.mulf %104, %107 : vector<8x32xf32>
    %110 = arith.addf %108, %109 : vector<8x32xf32>
    %111 = math.tanh %110 : vector<8x32xf32>
    %112 = arith.mulf %106, %111 : vector<8x32xf32>
    %113 = arith.index_cast %c3_i32 : i32 to index
    %c0_44 = arith.constant 0 : index
    %c0_45 = arith.constant 0 : index
    %114 = vector.load %arg8[%113, %c0_44, %c0_45] : memref<8x8x32xf32, #tpu.memory_space<vmem>>, vector<1x8x32xf32>
    %115 = vector.shape_cast %114 : vector<1x8x32xf32> to vector<8x32xf32>
    %116 = vector.shape_cast %112 : vector<8x32xf32> to vector<1x8x32xf32>
    tpu.vector_store %arg8[%113, %c0_44, %c0_45], %116 {strides = array<i32>} : memref<8x8x32xf32, #tpu.memory_space<vmem>>, vector<1x8x32xf32>,
    %c4_i32 = arith.constant 4 : i32
    %117 = arith.index_cast %c4_i32 : i32 to index
    %c0_46 = arith.constant 0 : index
    %c0_47 = arith.constant 0 : index
    %118 = vector.load %arg7[%117, %c0_46, %c0_47] : memref<8x8x128xf32, #tpu.memory_space<vmem>>, vector<1x8x128xf32>
    %119 = vector.shape_cast %118 : vector<1x8x128xf32> to vector<8x128xf32>
    %cst_48 = arith.constant dense<0.000000e+00> : vector<8x128xf32>
    %120 = tpu.matmul %112, %10, %cst_48 {dimension_numbers = #tpu.dot_dimension_numbers<[1], [0], [0], [1], [0, 0, 1, 1], [], []>} : vector<8x32xf32>, vector<32x128xf32>, vector<8x128xf32> -> vector<8x128xf32>
    %121 = arith.addf %119, %120 : vector<8x128xf32>
    %cst_49 = arith.constant 5.000000e-01 : f32
    %122 = vector.broadcast %cst_49 : f32 to vector<8x128xf32>
    %123 = arith.mulf %121, %122 : vector<8x128xf32>
    %124 = math.tanh %123 : vector<8x128xf32>
    %cst_50 = arith.constant 5.000000e-01 : f32
    %125 = vector.broadcast %cst_50 : f32 to vector<8x128xf32>
    %126 = arith.mulf %124, %125 : vector<8x128xf32>
    %cst_51 = arith.constant 5.000000e-01 : f32
    %127 = vector.broadcast %cst_51 : f32 to vector<8x128xf32>
    %128 = arith.addf %126, %127 : vector<8x128xf32>
    %129 = math.tanh %121 : vector<8x128xf32>
    %130 = vector.extract_strided_slice %128 {offsets = [0, 0], sizes = [8, 32], strides = [1, 1]} : vector<8x128xf32> to vector<8x32xf32>
    %131 = vector.extract_strided_slice %128 {offsets = [0, 32], sizes = [8, 32], strides = [1, 1]} : vector<8x128xf32> to vector<8x32xf32>
    %132 = vector.extract_strided_slice %128 {offsets = [0, 96], sizes = [8, 32], strides = [1, 1]} : vector<8x128xf32> to vector<8x32xf32>
    %133 = vector.extract_strided_slice %129 {offsets = [0, 64], sizes = [8, 32], strides = [1, 1]} : vector<8x128xf32> to vector<8x32xf32>
    %134 = arith.mulf %131, %110 : vector<8x32xf32>
    %135 = arith.mulf %130, %133 : vector<8x32xf32>
    %136 = arith.addf %134, %135 : vector<8x32xf32>
    %137 = math.tanh %136 : vector<8x32xf32>
    %138 = arith.mulf %132, %137 : vector<8x32xf32>
    %139 = arith.index_cast %c4_i32 : i32 to index
    %c0_52 = arith.constant 0 : index
    %c0_53 = arith.constant 0 : index
    %140 = vector.load %arg8[%139, %c0_52, %c0_53] : memref<8x8x32xf32, #tpu.memory_space<vmem>>, vector<1x8x32xf32>
    %141 = vector.shape_cast %140 : vector<1x8x32xf32> to vector<8x32xf32>
    %142 = vector.shape_cast %138 : vector<8x32xf32> to vector<1x8x32xf32>
    tpu.vector_store %arg8[%139, %c0_52, %c0_53], %142 {strides = array<i32>} : memref<8x8x32xf32, #tpu.memory_space<vmem>>, vector<1x8x32xf32>,
    %c5_i32 = arith.constant 5 : i32
    %143 = arith.index_cast %c5_i32 : i32 to index
    %c0_54 = arith.constant 0 : index
    %c0_55 = arith.constant 0 : index
    %144 = vector.load %arg7[%143, %c0_54, %c0_55] : memref<8x8x128xf32, #tpu.memory_space<vmem>>, vector<1x8x128xf32>
    %145 = vector.shape_cast %144 : vector<1x8x128xf32> to vector<8x128xf32>
    %cst_56 = arith.constant dense<0.000000e+00> : vector<8x128xf32>
    %146 = tpu.matmul %138, %10, %cst_56 {dimension_numbers = #tpu.dot_dimension_numbers<[1], [0], [0], [1], [0, 0, 1, 1], [], []>} : vector<8x32xf32>, vector<32x128xf32>, vector<8x128xf32> -> vector<8x128xf32>
    %147 = arith.addf %145, %146 : vector<8x128xf32>
    %cst_57 = arith.constant 5.000000e-01 : f32
    %148 = vector.broadcast %cst_57 : f32 to vector<8x128xf32>
    %149 = arith.mulf %147, %148 : vector<8x128xf32>
    %150 = math.tanh %149 : vector<8x128xf32>
    %cst_58 = arith.constant 5.000000e-01 : f32
    %151 = vector.broadcast %cst_58 : f32 to vector<8x128xf32>
    %152 = arith.mulf %150, %151 : vector<8x128xf32>
    %cst_59 = arith.constant 5.000000e-01 : f32
    %153 = vector.broadcast %cst_59 : f32 to vector<8x128xf32>
    %154 = arith.addf %152, %153 : vector<8x128xf32>
    %155 = math.tanh %147 : vector<8x128xf32>
    %156 = vector.extract_strided_slice %154 {offsets = [0, 0], sizes = [8, 32], strides = [1, 1]} : vector<8x128xf32> to vector<8x32xf32>
    %157 = vector.extract_strided_slice %154 {offsets = [0, 32], sizes = [8, 32], strides = [1, 1]} : vector<8x128xf32> to vector<8x32xf32>
    %158 = vector.extract_strided_slice %154 {offsets = [0, 96], sizes = [8, 32], strides = [1, 1]} : vector<8x128xf32> to vector<8x32xf32>
    %159 = vector.extract_strided_slice %155 {offsets = [0, 64], sizes = [8, 32], strides = [1, 1]} : vector<8x128xf32> to vector<8x32xf32>
    %160 = arith.mulf %157, %136 : vector<8x32xf32>
    %161 = arith.mulf %156, %159 : vector<8x32xf32>
    %162 = arith.addf %160, %161 : vector<8x32xf32>
    %163 = math.tanh %162 : vector<8x32xf32>
    %164 = arith.mulf %158, %163 : vector<8x32xf32>
    %165 = arith.index_cast %c5_i32 : i32 to index
    %c0_60 = arith.constant 0 : index
    %c0_61 = arith.constant 0 : index
    %166 = vector.load %arg8[%165, %c0_60, %c0_61] : memref<8x8x32xf32, #tpu.memory_space<vmem>>, vector<1x8x32xf32>
    %167 = vector.shape_cast %166 : vector<1x8x32xf32> to vector<8x32xf32>
    %168 = vector.shape_cast %164 : vector<8x32xf32> to vector<1x8x32xf32>
    tpu.vector_store %arg8[%165, %c0_60, %c0_61], %168 {strides = array<i32>} : memref<8x8x32xf32, #tpu.memory_space<vmem>>, vector<1x8x32xf32>,
    %c6_i32 = arith.constant 6 : i32
    %169 = arith.index_cast %c6_i32 : i32 to index
    %c0_62 = arith.constant 0 : index
    %c0_63 = arith.constant 0 : index
    %170 = vector.load %arg7[%169, %c0_62, %c0_63] : memref<8x8x128xf32, #tpu.memory_space<vmem>>, vector<1x8x128xf32>
    %171 = vector.shape_cast %170 : vector<1x8x128xf32> to vector<8x128xf32>
    %cst_64 = arith.constant dense<0.000000e+00> : vector<8x128xf32>
    %172 = tpu.matmul %164, %10, %cst_64 {dimension_numbers = #tpu.dot_dimension_numbers<[1], [0], [0], [1], [0, 0, 1, 1], [], []>} : vector<8x32xf32>, vector<32x128xf32>, vector<8x128xf32> -> vector<8x128xf32>
    %173 = arith.addf %171, %172 : vector<8x128xf32>
    %cst_65 = arith.constant 5.000000e-01 : f32
    %174 = vector.broadcast %cst_65 : f32 to vector<8x128xf32>
    %175 = arith.mulf %173, %174 : vector<8x128xf32>
    %176 = math.tanh %175 : vector<8x128xf32>
    %cst_66 = arith.constant 5.000000e-01 : f32
    %177 = vector.broadcast %cst_66 : f32 to vector<8x128xf32>
    %178 = arith.mulf %176, %177 : vector<8x128xf32>
    %cst_67 = arith.constant 5.000000e-01 : f32
    %179 = vector.broadcast %cst_67 : f32 to vector<8x128xf32>
    %180 = arith.addf %178, %179 : vector<8x128xf32>
    %181 = math.tanh %173 : vector<8x128xf32>
    %182 = vector.extract_strided_slice %180 {offsets = [0, 0], sizes = [8, 32], strides = [1, 1]} : vector<8x128xf32> to vector<8x32xf32>
    %183 = vector.extract_strided_slice %180 {offsets = [0, 32], sizes = [8, 32], strides = [1, 1]} : vector<8x128xf32> to vector<8x32xf32>
    %184 = vector.extract_strided_slice %180 {offsets = [0, 96], sizes = [8, 32], strides = [1, 1]} : vector<8x128xf32> to vector<8x32xf32>
    %185 = vector.extract_strided_slice %181 {offsets = [0, 64], sizes = [8, 32], strides = [1, 1]} : vector<8x128xf32> to vector<8x32xf32>
    %186 = arith.mulf %183, %162 : vector<8x32xf32>
    %187 = arith.mulf %182, %185 : vector<8x32xf32>
    %188 = arith.addf %186, %187 : vector<8x32xf32>
    %189 = math.tanh %188 : vector<8x32xf32>
    %190 = arith.mulf %184, %189 : vector<8x32xf32>
    %191 = arith.index_cast %c6_i32 : i32 to index
    %c0_68 = arith.constant 0 : index
    %c0_69 = arith.constant 0 : index
    %192 = vector.load %arg8[%191, %c0_68, %c0_69] : memref<8x8x32xf32, #tpu.memory_space<vmem>>, vector<1x8x32xf32>
    %193 = vector.shape_cast %192 : vector<1x8x32xf32> to vector<8x32xf32>
    %194 = vector.shape_cast %190 : vector<8x32xf32> to vector<1x8x32xf32>
    tpu.vector_store %arg8[%191, %c0_68, %c0_69], %194 {strides = array<i32>} : memref<8x8x32xf32, #tpu.memory_space<vmem>>, vector<1x8x32xf32>,
    %c7_i32 = arith.constant 7 : i32
    %195 = arith.index_cast %c7_i32 : i32 to index
    %c0_70 = arith.constant 0 : index
    %c0_71 = arith.constant 0 : index
    %196 = vector.load %arg7[%195, %c0_70, %c0_71] : memref<8x8x128xf32, #tpu.memory_space<vmem>>, vector<1x8x128xf32>
    %197 = vector.shape_cast %196 : vector<1x8x128xf32> to vector<8x128xf32>
    %cst_72 = arith.constant dense<0.000000e+00> : vector<8x128xf32>
    %198 = tpu.matmul %190, %10, %cst_72 {dimension_numbers = #tpu.dot_dimension_numbers<[1], [0], [0], [1], [0, 0, 1, 1], [], []>} : vector<8x32xf32>, vector<32x128xf32>, vector<8x128xf32> -> vector<8x128xf32>
    %199 = arith.addf %197, %198 : vector<8x128xf32>
    %cst_73 = arith.constant 5.000000e-01 : f32
    %200 = vector.broadcast %cst_73 : f32 to vector<8x128xf32>
    %201 = arith.mulf %199, %200 : vector<8x128xf32>
    %202 = math.tanh %201 : vector<8x128xf32>
    %cst_74 = arith.constant 5.000000e-01 : f32
    %203 = vector.broadcast %cst_74 : f32 to vector<8x128xf32>
    %204 = arith.mulf %202, %203 : vector<8x128xf32>
    %cst_75 = arith.constant 5.000000e-01 : f32
    %205 = vector.broadcast %cst_75 : f32 to vector<8x128xf32>
    %206 = arith.addf %204, %205 : vector<8x128xf32>
    %207 = math.tanh %199 : vector<8x128xf32>
    %208 = vector.extract_strided_slice %206 {offsets = [0, 0], sizes = [8, 32], strides = [1, 1]} : vector<8x128xf32> to vector<8x32xf32>
    %209 = vector.extract_strided_slice %206 {offsets = [0, 32], sizes = [8, 32], strides = [1, 1]} : vector<8x128xf32> to vector<8x32xf32>
    %210 = vector.extract_strided_slice %206 {offsets = [0, 96], sizes = [8, 32], strides = [1, 1]} : vector<8x128xf32> to vector<8x32xf32>
    %211 = vector.extract_strided_slice %207 {offsets = [0, 64], sizes = [8, 32], strides = [1, 1]} : vector<8x128xf32> to vector<8x32xf32>
    %212 = arith.mulf %209, %188 : vector<8x32xf32>
    %213 = arith.mulf %208, %211 : vector<8x32xf32>
    %214 = arith.addf %212, %213 : vector<8x32xf32>
    %215 = math.tanh %214 : vector<8x32xf32>
    %216 = arith.mulf %210, %215 : vector<8x32xf32>
    %217 = arith.index_cast %c7_i32 : i32 to index
    %c0_76 = arith.constant 0 : index
    %c0_77 = arith.constant 0 : index
    %218 = vector.load %arg8[%217, %c0_76, %c0_77] : memref<8x8x32xf32, #tpu.memory_space<vmem>>, vector<1x8x32xf32>
    %219 = vector.shape_cast %218 : vector<1x8x32xf32> to vector<8x32xf32>
    %220 = vector.shape_cast %216 : vector<8x32xf32> to vector<1x8x32xf32>
    tpu.vector_store %arg8[%217, %c0_76, %c0_77], %220 {strides = array<i32>} : memref<8x8x32xf32, #tpu.memory_space<vmem>>, vector<1x8x32xf32>,
    %c8_i32 = arith.constant 8 : i32
    %c0_78 = arith.constant 0 : index
    %c0_79 = arith.constant 0 : index
    %c0_80 = arith.constant 0 : index
    %221 = vector.load %arg5[%c0_78, %c0_79, %c0_80] : memref<2x8x32xf32, #tpu.memory_space<vmem>>, vector<1x8x32xf32>
    %222 = vector.shape_cast %221 : vector<1x8x32xf32> to vector<8x32xf32>
    %223 = vector.shape_cast %216 : vector<8x32xf32> to vector<1x8x32xf32>
    tpu.vector_store %arg5[%c0_78, %c0_79, %c0_80], %223 {strides = array<i32>} : memref<2x8x32xf32, #tpu.memory_space<vmem>>, vector<1x8x32xf32>,
    %c0_81 = arith.constant 0 : index
    %c0_82 = arith.constant 0 : index
    %c0_83 = arith.constant 0 : index
    %224 = vector.load %arg6[%c0_81, %c0_82, %c0_83] : memref<2x8x32xf32, #tpu.memory_space<vmem>>, vector<1x8x32xf32>
    %225 = vector.shape_cast %224 : vector<1x8x32xf32> to vector<8x32xf32>
    %226 = vector.shape_cast %214 : vector<8x32xf32> to vector<1x8x32xf32>
    tpu.vector_store %arg6[%c0_81, %c0_82, %c0_83], %226 {strides = array<i32>} : memref<2x8x32xf32, #tpu.memory_space<vmem>>, vector<1x8x32xf32>,
    %c0_84 = arith.constant 0 : index
    %c0_85 = arith.constant 0 : index
    %c0_86 = arith.constant 0 : index
    %227 = vector.load %arg8[%c0_84, %c0_85, %c0_86] : memref<8x8x32xf32, #tpu.memory_space<vmem>>, vector<8x8x32xf32>
    %228 = vector.shape_cast %227 : vector<8x8x32xf32> to vector<64x32xf32>
    %c0_87 = arith.constant 0 : index
    %c0_88 = arith.constant 0 : index
    %c0_89 = arith.constant 0 : index
    %229 = vector.load %arg2[%c0_87, %c0_88, %c0_89] : memref<1x32x128xf32, #tpu.memory_space<vmem>>, vector<1x32x128xf32>
    %230 = vector.shape_cast %229 : vector<1x32x128xf32> to vector<32x128xf32>
    %cst_90 = arith.constant dense<0.000000e+00> : vector<64x128xf32>
    %231 = tpu.matmul %228, %230, %cst_90 {dimension_numbers = #tpu.dot_dimension_numbers<[1], [0], [0], [1], [0, 0, 1, 1], [], []>} : vector<64x32xf32>, vector<32x128xf32>, vector<64x128xf32> -> vector<64x128xf32>
    %c1 = arith.constant 1 : index
    %c0_91 = arith.constant 0 : index
    %c0_92 = arith.constant 0 : index
    %232 = vector.load %arg4[%c1, %c0_91, %c0_92] : memref<2x1x128xf32, #tpu.memory_space<vmem>>, vector<1x1x128xf32>
    %233 = vector.shape_cast %232 : vector<1x1x128xf32> to vector<1x128xf32>
    %234 = vector.broadcast %233 : vector<1x128xf32> to vector<64x128xf32>
    %235 = arith.addf %231, %234 : vector<64x128xf32>
    %236 = vector.shape_cast %235 : vector<64x128xf32> to vector<8x8x128xf32>
    %c0_93 = arith.constant 0 : index
    %c0_94 = arith.constant 0 : index
    %c0_95 = arith.constant 0 : index
    %237 = vector.load %arg7[%c0_93, %c0_94, %c0_95] : memref<8x8x128xf32, #tpu.memory_space<vmem>>, vector<8x8x128xf32>
    tpu.vector_store %arg7[%c0_93, %c0_94, %c0_95], %236 {strides = array<i32>} : memref<8x8x128xf32, #tpu.memory_space<vmem>>, vector<8x8x128xf32>,
    %c1_96 = arith.constant 1 : index
    %c0_97 = arith.constant 0 : index
    %c0_98 = arith.constant 0 : index
    %238 = vector.load %arg3[%c1_96, %c0_97, %c0_98] : memref<2x32x128xf32, #tpu.memory_space<vmem>>, vector<1x32x128xf32>
    %239 = vector.shape_cast %238 : vector<1x32x128xf32> to vector<32x128xf32>
    %cst_99 = arith.constant 0.000000e+00 : f32
    %240 = vector.broadcast %cst_99 : f32 to vector<8x32xf32>
    %cst_100 = arith.constant 0.000000e+00 : f32
    %241 = vector.broadcast %cst_100 : f32 to vector<8x32xf32>
    %c0_i32_101 = arith.constant 0 : i32
    %242 = arith.index_cast %c0_i32_101 : i32 to index
    %c0_102 = arith.constant 0 : index
    %c0_103 = arith.constant 0 : index
    %243 = vector.load %arg7[%242, %c0_102, %c0_103] : memref<8x8x128xf32, #tpu.memory_space<vmem>>, vector<1x8x128xf32>
    %244 = vector.shape_cast %243 : vector<1x8x128xf32> to vector<8x128xf32>
    %cst_104 = arith.constant dense<0.000000e+00> : vector<8x128xf32>
    %245 = tpu.matmul %240, %239, %cst_104 {dimension_numbers = #tpu.dot_dimension_numbers<[1], [0], [0], [1], [0, 0, 1, 1], [], []>} : vector<8x32xf32>, vector<32x128xf32>, vector<8x128xf32> -> vector<8x128xf32>
    %246 = arith.addf %244, %245 : vector<8x128xf32>
    %cst_105 = arith.constant 5.000000e-01 : f32
    %247 = vector.broadcast %cst_105 : f32 to vector<8x128xf32>
    %248 = arith.mulf %246, %247 : vector<8x128xf32>
    %249 = math.tanh %248 : vector<8x128xf32>
    %cst_106 = arith.constant 5.000000e-01 : f32
    %250 = vector.broadcast %cst_106 : f32 to vector<8x128xf32>
    %251 = arith.mulf %249, %250 : vector<8x128xf32>
    %cst_107 = arith.constant 5.000000e-01 : f32
    %252 = vector.broadcast %cst_107 : f32 to vector<8x128xf32>
    %253 = arith.addf %251, %252 : vector<8x128xf32>
    %254 = math.tanh %246 : vector<8x128xf32>
    %255 = vector.extract_strided_slice %253 {offsets = [0, 0], sizes = [8, 32], strides = [1, 1]} : vector<8x128xf32> to vector<8x32xf32>
    %256 = vector.extract_strided_slice %253 {offsets = [0, 32], sizes = [8, 32], strides = [1, 1]} : vector<8x128xf32> to vector<8x32xf32>
    %257 = vector.extract_strided_slice %253 {offsets = [0, 96], sizes = [8, 32], strides = [1, 1]} : vector<8x128xf32> to vector<8x32xf32>
    %258 = vector.extract_strided_slice %254 {offsets = [0, 64], sizes = [8, 32], strides = [1, 1]} : vector<8x128xf32> to vector<8x32xf32>
    %259 = arith.mulf %256, %241 : vector<8x32xf32>
    %260 = arith.mulf %255, %258 : vector<8x32xf32>
    %261 = arith.addf %259, %260 : vector<8x32xf32>
    %262 = math.tanh %261 : vector<8x32xf32>
    %263 = arith.mulf %257, %262 : vector<8x32xf32>
    %c1_i32_108 = arith.constant 1 : i32
    %264 = arith.index_cast %c1_i32_108 : i32 to index
    %c0_109 = arith.constant 0 : index
    %c0_110 = arith.constant 0 : index
    %265 = vector.load %arg7[%264, %c0_109, %c0_110] : memref<8x8x128xf32, #tpu.memory_space<vmem>>, vector<1x8x128xf32>
    %266 = vector.shape_cast %265 : vector<1x8x128xf32> to vector<8x128xf32>
    %cst_111 = arith.constant dense<0.000000e+00> : vector<8x128xf32>
    %267 = tpu.matmul %263, %239, %cst_111 {dimension_numbers = #tpu.dot_dimension_numbers<[1], [0], [0], [1], [0, 0, 1, 1], [], []>} : vector<8x32xf32>, vector<32x128xf32>, vector<8x128xf32> -> vector<8x128xf32>
    %268 = arith.addf %266, %267 : vector<8x128xf32>
    %cst_112 = arith.constant 5.000000e-01 : f32
    %269 = vector.broadcast %cst_112 : f32 to vector<8x128xf32>
    %270 = arith.mulf %268, %269 : vector<8x128xf32>
    %271 = math.tanh %270 : vector<8x128xf32>
    %cst_113 = arith.constant 5.000000e-01 : f32
    %272 = vector.broadcast %cst_113 : f32 to vector<8x128xf32>
    %273 = arith.mulf %271, %272 : vector<8x128xf32>
    %cst_114 = arith.constant 5.000000e-01 : f32
    %274 = vector.broadcast %cst_114 : f32 to vector<8x128xf32>
    %275 = arith.addf %273, %274 : vector<8x128xf32>
    %276 = math.tanh %268 : vector<8x128xf32>
    %277 = vector.extract_strided_slice %275 {offsets = [0, 0], sizes = [8, 32], strides = [1, 1]} : vector<8x128xf32> to vector<8x32xf32>
    %278 = vector.extract_strided_slice %275 {offsets = [0, 32], sizes = [8, 32], strides = [1, 1]} : vector<8x128xf32> to vector<8x32xf32>
    %279 = vector.extract_strided_slice %275 {offsets = [0, 96], sizes = [8, 32], strides = [1, 1]} : vector<8x128xf32> to vector<8x32xf32>
    %280 = vector.extract_strided_slice %276 {offsets = [0, 64], sizes = [8, 32], strides = [1, 1]} : vector<8x128xf32> to vector<8x32xf32>
    %281 = arith.mulf %278, %261 : vector<8x32xf32>
    %282 = arith.mulf %277, %280 : vector<8x32xf32>
    %283 = arith.addf %281, %282 : vector<8x32xf32>
    %284 = math.tanh %283 : vector<8x32xf32>
    %285 = arith.mulf %279, %284 : vector<8x32xf32>
    %c2_i32_115 = arith.constant 2 : i32
    %286 = arith.index_cast %c2_i32_115 : i32 to index
    %c0_116 = arith.constant 0 : index
    %c0_117 = arith.constant 0 : index
    %287 = vector.load %arg7[%286, %c0_116, %c0_117] : memref<8x8x128xf32, #tpu.memory_space<vmem>>, vector<1x8x128xf32>
    %288 = vector.shape_cast %287 : vector<1x8x128xf32> to vector<8x128xf32>
    %cst_118 = arith.constant dense<0.000000e+00> : vector<8x128xf32>
    %289 = tpu.matmul %285, %239, %cst_118 {dimension_numbers = #tpu.dot_dimension_numbers<[1], [0], [0], [1], [0, 0, 1, 1], [], []>} : vector<8x32xf32>, vector<32x128xf32>, vector<8x128xf32> -> vector<8x128xf32>
    %290 = arith.addf %288, %289 : vector<8x128xf32>
    %cst_119 = arith.constant 5.000000e-01 : f32
    %291 = vector.broadcast %cst_119 : f32 to vector<8x128xf32>
    %292 = arith.mulf %290, %291 : vector<8x128xf32>
    %293 = math.tanh %292 : vector<8x128xf32>
    %cst_120 = arith.constant 5.000000e-01 : f32
    %294 = vector.broadcast %cst_120 : f32 to vector<8x128xf32>
    %295 = arith.mulf %293, %294 : vector<8x128xf32>
    %cst_121 = arith.constant 5.000000e-01 : f32
    %296 = vector.broadcast %cst_121 : f32 to vector<8x128xf32>
    %297 = arith.addf %295, %296 : vector<8x128xf32>
    %298 = math.tanh %290 : vector<8x128xf32>
    %299 = vector.extract_strided_slice %297 {offsets = [0, 0], sizes = [8, 32], strides = [1, 1]} : vector<8x128xf32> to vector<8x32xf32>
    %300 = vector.extract_strided_slice %297 {offsets = [0, 32], sizes = [8, 32], strides = [1, 1]} : vector<8x128xf32> to vector<8x32xf32>
    %301 = vector.extract_strided_slice %297 {offsets = [0, 96], sizes = [8, 32], strides = [1, 1]} : vector<8x128xf32> to vector<8x32xf32>
    %302 = vector.extract_strided_slice %298 {offsets = [0, 64], sizes = [8, 32], strides = [1, 1]} : vector<8x128xf32> to vector<8x32xf32>
    %303 = arith.mulf %300, %283 : vector<8x32xf32>
    %304 = arith.mulf %299, %302 : vector<8x32xf32>
    %305 = arith.addf %303, %304 : vector<8x32xf32>
    %306 = math.tanh %305 : vector<8x32xf32>
    %307 = arith.mulf %301, %306 : vector<8x32xf32>
    %c3_i32_122 = arith.constant 3 : i32
    %308 = arith.index_cast %c3_i32_122 : i32 to index
    %c0_123 = arith.constant 0 : index
    %c0_124 = arith.constant 0 : index
    %309 = vector.load %arg7[%308, %c0_123, %c0_124] : memref<8x8x128xf32, #tpu.memory_space<vmem>>, vector<1x8x128xf32>
    %310 = vector.shape_cast %309 : vector<1x8x128xf32> to vector<8x128xf32>
    %cst_125 = arith.constant dense<0.000000e+00> : vector<8x128xf32>
    %311 = tpu.matmul %307, %239, %cst_125 {dimension_numbers = #tpu.dot_dimension_numbers<[1], [0], [0], [1], [0, 0, 1, 1], [], []>} : vector<8x32xf32>, vector<32x128xf32>, vector<8x128xf32> -> vector<8x128xf32>
    %312 = arith.addf %310, %311 : vector<8x128xf32>
    %cst_126 = arith.constant 5.000000e-01 : f32
    %313 = vector.broadcast %cst_126 : f32 to vector<8x128xf32>
    %314 = arith.mulf %312, %313 : vector<8x128xf32>
    %315 = math.tanh %314 : vector<8x128xf32>
    %cst_127 = arith.constant 5.000000e-01 : f32
    %316 = vector.broadcast %cst_127 : f32 to vector<8x128xf32>
    %317 = arith.mulf %315, %316 : vector<8x128xf32>
    %cst_128 = arith.constant 5.000000e-01 : f32
    %318 = vector.broadcast %cst_128 : f32 to vector<8x128xf32>
    %319 = arith.addf %317, %318 : vector<8x128xf32>
    %320 = math.tanh %312 : vector<8x128xf32>
    %321 = vector.extract_strided_slice %319 {offsets = [0, 0], sizes = [8, 32], strides = [1, 1]} : vector<8x128xf32> to vector<8x32xf32>
    %322 = vector.extract_strided_slice %319 {offsets = [0, 32], sizes = [8, 32], strides = [1, 1]} : vector<8x128xf32> to vector<8x32xf32>
    %323 = vector.extract_strided_slice %319 {offsets = [0, 96], sizes = [8, 32], strides = [1, 1]} : vector<8x128xf32> to vector<8x32xf32>
    %324 = vector.extract_strided_slice %320 {offsets = [0, 64], sizes = [8, 32], strides = [1, 1]} : vector<8x128xf32> to vector<8x32xf32>
    %325 = arith.mulf %322, %305 : vector<8x32xf32>
    %326 = arith.mulf %321, %324 : vector<8x32xf32>
    %327 = arith.addf %325, %326 : vector<8x32xf32>
    %328 = math.tanh %327 : vector<8x32xf32>
    %329 = arith.mulf %323, %328 : vector<8x32xf32>
    %c4_i32_129 = arith.constant 4 : i32
    %330 = arith.index_cast %c4_i32_129 : i32 to index
    %c0_130 = arith.constant 0 : index
    %c0_131 = arith.constant 0 : index
    %331 = vector.load %arg7[%330, %c0_130, %c0_131] : memref<8x8x128xf32, #tpu.memory_space<vmem>>, vector<1x8x128xf32>
    %332 = vector.shape_cast %331 : vector<1x8x128xf32> to vector<8x128xf32>
    %cst_132 = arith.constant dense<0.000000e+00> : vector<8x128xf32>
    %333 = tpu.matmul %329, %239, %cst_132 {dimension_numbers = #tpu.dot_dimension_numbers<[1], [0], [0], [1], [0, 0, 1, 1], [], []>} : vector<8x32xf32>, vector<32x128xf32>, vector<8x128xf32> -> vector<8x128xf32>
    %334 = arith.addf %332, %333 : vector<8x128xf32>
    %cst_133 = arith.constant 5.000000e-01 : f32
    %335 = vector.broadcast %cst_133 : f32 to vector<8x128xf32>
    %336 = arith.mulf %334, %335 : vector<8x128xf32>
    %337 = math.tanh %336 : vector<8x128xf32>
    %cst_134 = arith.constant 5.000000e-01 : f32
    %338 = vector.broadcast %cst_134 : f32 to vector<8x128xf32>
    %339 = arith.mulf %337, %338 : vector<8x128xf32>
    %cst_135 = arith.constant 5.000000e-01 : f32
    %340 = vector.broadcast %cst_135 : f32 to vector<8x128xf32>
    %341 = arith.addf %339, %340 : vector<8x128xf32>
    %342 = math.tanh %334 : vector<8x128xf32>
    %343 = vector.extract_strided_slice %341 {offsets = [0, 0], sizes = [8, 32], strides = [1, 1]} : vector<8x128xf32> to vector<8x32xf32>
    %344 = vector.extract_strided_slice %341 {offsets = [0, 32], sizes = [8, 32], strides = [1, 1]} : vector<8x128xf32> to vector<8x32xf32>
    %345 = vector.extract_strided_slice %341 {offsets = [0, 96], sizes = [8, 32], strides = [1, 1]} : vector<8x128xf32> to vector<8x32xf32>
    %346 = vector.extract_strided_slice %342 {offsets = [0, 64], sizes = [8, 32], strides = [1, 1]} : vector<8x128xf32> to vector<8x32xf32>
    %347 = arith.mulf %344, %327 : vector<8x32xf32>
    %348 = arith.mulf %343, %346 : vector<8x32xf32>
    %349 = arith.addf %347, %348 : vector<8x32xf32>
    %350 = math.tanh %349 : vector<8x32xf32>
    %351 = arith.mulf %345, %350 : vector<8x32xf32>
    %c5_i32_136 = arith.constant 5 : i32
    %352 = arith.index_cast %c5_i32_136 : i32 to index
    %c0_137 = arith.constant 0 : index
    %c0_138 = arith.constant 0 : index
    %353 = vector.load %arg7[%352, %c0_137, %c0_138] : memref<8x8x128xf32, #tpu.memory_space<vmem>>, vector<1x8x128xf32>
    %354 = vector.shape_cast %353 : vector<1x8x128xf32> to vector<8x128xf32>
    %cst_139 = arith.constant dense<0.000000e+00> : vector<8x128xf32>
    %355 = tpu.matmul %351, %239, %cst_139 {dimension_numbers = #tpu.dot_dimension_numbers<[1], [0], [0], [1], [0, 0, 1, 1], [], []>} : vector<8x32xf32>, vector<32x128xf32>, vector<8x128xf32> -> vector<8x128xf32>
    %356 = arith.addf %354, %355 : vector<8x128xf32>
    %cst_140 = arith.constant 5.000000e-01 : f32
    %357 = vector.broadcast %cst_140 : f32 to vector<8x128xf32>
    %358 = arith.mulf %356, %357 : vector<8x128xf32>
    %359 = math.tanh %358 : vector<8x128xf32>
    %cst_141 = arith.constant 5.000000e-01 : f32
    %360 = vector.broadcast %cst_141 : f32 to vector<8x128xf32>
    %361 = arith.mulf %359, %360 : vector<8x128xf32>
    %cst_142 = arith.constant 5.000000e-01 : f32
    %362 = vector.broadcast %cst_142 : f32 to vector<8x128xf32>
    %363 = arith.addf %361, %362 : vector<8x128xf32>
    %364 = math.tanh %356 : vector<8x128xf32>
    %365 = vector.extract_strided_slice %363 {offsets = [0, 0], sizes = [8, 32], strides = [1, 1]} : vector<8x128xf32> to vector<8x32xf32>
    %366 = vector.extract_strided_slice %363 {offsets = [0, 32], sizes = [8, 32], strides = [1, 1]} : vector<8x128xf32> to vector<8x32xf32>
    %367 = vector.extract_strided_slice %363 {offsets = [0, 96], sizes = [8, 32], strides = [1, 1]} : vector<8x128xf32> to vector<8x32xf32>
    %368 = vector.extract_strided_slice %364 {offsets = [0, 64], sizes = [8, 32], strides = [1, 1]} : vector<8x128xf32> to vector<8x32xf32>
    %369 = arith.mulf %366, %349 : vector<8x32xf32>
    %370 = arith.mulf %365, %368 : vector<8x32xf32>
    %371 = arith.addf %369, %370 : vector<8x32xf32>
    %372 = math.tanh %371 : vector<8x32xf32>
    %373 = arith.mulf %367, %372 : vector<8x32xf32>
    %c6_i32_143 = arith.constant 6 : i32
    %374 = arith.index_cast %c6_i32_143 : i32 to index
    %c0_144 = arith.constant 0 : index
    %c0_145 = arith.constant 0 : index
    %375 = vector.load %arg7[%374, %c0_144, %c0_145] : memref<8x8x128xf32, #tpu.memory_space<vmem>>, vector<1x8x128xf32>
    %376 = vector.shape_cast %375 : vector<1x8x128xf32> to vector<8x128xf32>
    %cst_146 = arith.constant dense<0.000000e+00> : vector<8x128xf32>
    %377 = tpu.matmul %373, %239, %cst_146 {dimension_numbers = #tpu.dot_dimension_numbers<[1], [0], [0], [1], [0, 0, 1, 1], [], []>} : vector<8x32xf32>, vector<32x128xf32>, vector<8x128xf32> -> vector<8x128xf32>
    %378 = arith.addf %376, %377 : vector<8x128xf32>
    %cst_147 = arith.constant 5.000000e-01 : f32
    %379 = vector.broadcast %cst_147 : f32 to vector<8x128xf32>
    %380 = arith.mulf %378, %379 : vector<8x128xf32>
    %381 = math.tanh %380 : vector<8x128xf32>
    %cst_148 = arith.constant 5.000000e-01 : f32
    %382 = vector.broadcast %cst_148 : f32 to vector<8x128xf32>
    %383 = arith.mulf %381, %382 : vector<8x128xf32>
    %cst_149 = arith.constant 5.000000e-01 : f32
    %384 = vector.broadcast %cst_149 : f32 to vector<8x128xf32>
    %385 = arith.addf %383, %384 : vector<8x128xf32>
    %386 = math.tanh %378 : vector<8x128xf32>
    %387 = vector.extract_strided_slice %385 {offsets = [0, 0], sizes = [8, 32], strides = [1, 1]} : vector<8x128xf32> to vector<8x32xf32>
    %388 = vector.extract_strided_slice %385 {offsets = [0, 32], sizes = [8, 32], strides = [1, 1]} : vector<8x128xf32> to vector<8x32xf32>
    %389 = vector.extract_strided_slice %385 {offsets = [0, 96], sizes = [8, 32], strides = [1, 1]} : vector<8x128xf32> to vector<8x32xf32>
    %390 = vector.extract_strided_slice %386 {offsets = [0, 64], sizes = [8, 32], strides = [1, 1]} : vector<8x128xf32> to vector<8x32xf32>
    %391 = arith.mulf %388, %371 : vector<8x32xf32>
    %392 = arith.mulf %387, %390 : vector<8x32xf32>
    %393 = arith.addf %391, %392 : vector<8x32xf32>
    %394 = math.tanh %393 : vector<8x32xf32>
    %395 = arith.mulf %389, %394 : vector<8x32xf32>
    %c7_i32_150 = arith.constant 7 : i32
    %396 = arith.index_cast %c7_i32_150 : i32 to index
    %c0_151 = arith.constant 0 : index
    %c0_152 = arith.constant 0 : index
    %397 = vector.load %arg7[%396, %c0_151, %c0_152] : memref<8x8x128xf32, #tpu.memory_space<vmem>>, vector<1x8x128xf32>
    %398 = vector.shape_cast %397 : vector<1x8x128xf32> to vector<8x128xf32>
    %cst_153 = arith.constant dense<0.000000e+00> : vector<8x128xf32>
    %399 = tpu.matmul %395, %239, %cst_153 {dimension_numbers = #tpu.dot_dimension_numbers<[1], [0], [0], [1], [0, 0, 1, 1], [], []>} : vector<8x32xf32>, vector<32x128xf32>, vector<8x128xf32> -> vector<8x128xf32>
    %400 = arith.addf %398, %399 : vector<8x128xf32>
    %cst_154 = arith.constant 5.000000e-01 : f32
    %401 = vector.broadcast %cst_154 : f32 to vector<8x128xf32>
    %402 = arith.mulf %400, %401 : vector<8x128xf32>
    %403 = math.tanh %402 : vector<8x128xf32>
    %cst_155 = arith.constant 5.000000e-01 : f32
    %404 = vector.broadcast %cst_155 : f32 to vector<8x128xf32>
    %405 = arith.mulf %403, %404 : vector<8x128xf32>
    %cst_156 = arith.constant 5.000000e-01 : f32
    %406 = vector.broadcast %cst_156 : f32 to vector<8x128xf32>
    %407 = arith.addf %405, %406 : vector<8x128xf32>
    %408 = math.tanh %400 : vector<8x128xf32>
    %409 = vector.extract_strided_slice %407 {offsets = [0, 0], sizes = [8, 32], strides = [1, 1]} : vector<8x128xf32> to vector<8x32xf32>
    %410 = vector.extract_strided_slice %407 {offsets = [0, 32], sizes = [8, 32], strides = [1, 1]} : vector<8x128xf32> to vector<8x32xf32>
    %411 = vector.extract_strided_slice %407 {offsets = [0, 96], sizes = [8, 32], strides = [1, 1]} : vector<8x128xf32> to vector<8x32xf32>
    %412 = vector.extract_strided_slice %408 {offsets = [0, 64], sizes = [8, 32], strides = [1, 1]} : vector<8x128xf32> to vector<8x32xf32>
    %413 = arith.mulf %410, %393 : vector<8x32xf32>
    %414 = arith.mulf %409, %412 : vector<8x32xf32>
    %415 = arith.addf %413, %414 : vector<8x32xf32>
    %416 = math.tanh %415 : vector<8x32xf32>
    %417 = arith.mulf %411, %416 : vector<8x32xf32>
    %c8_i32_157 = arith.constant 8 : i32
    %c1_158 = arith.constant 1 : index
    %c0_159 = arith.constant 0 : index
    %c0_160 = arith.constant 0 : index
    %418 = vector.load %arg5[%c1_158, %c0_159, %c0_160] : memref<2x8x32xf32, #tpu.memory_space<vmem>>, vector<1x8x32xf32>
    %419 = vector.shape_cast %418 : vector<1x8x32xf32> to vector<8x32xf32>
    %420 = vector.shape_cast %417 : vector<8x32xf32> to vector<1x8x32xf32>
    tpu.vector_store %arg5[%c1_158, %c0_159, %c0_160], %420 {strides = array<i32>} : memref<2x8x32xf32, #tpu.memory_space<vmem>>, vector<1x8x32xf32>,
    %c1_161 = arith.constant 1 : index
    %c0_162 = arith.constant 0 : index
    %c0_163 = arith.constant 0 : index
    %421 = vector.load %arg6[%c1_161, %c0_162, %c0_163] : memref<2x8x32xf32, #tpu.memory_space<vmem>>, vector<1x8x32xf32>
    %422 = vector.shape_cast %421 : vector<1x8x32xf32> to vector<8x32xf32>
    %423 = vector.shape_cast %415 : vector<8x32xf32> to vector<1x8x32xf32>
    tpu.vector_store %arg6[%c1_161, %c0_162, %c0_163], %423 {strides = array<i32>} : memref<2x8x32xf32, #tpu.memory_space<vmem>>, vector<1x8x32xf32>,
    return
  }
}

</mosaic_0001>

<bundles_post_ra>
// kernel: tpu_custom_call.1
= control target key start
LH: loop header
LB: loop body
LE: loop exit
PB: predicated region body
PF: predicated region fallthrough
CT: control target
= control target key end

     0   :  { %12 = vsyncpa [#allocation5], 0  ;;  %s1654_s0 = inlined_call_operand.vmem [shape: f32[64,16], index: 0, kind: input, shape index: {}]   ;;  %s1655_s1 = inlined_call_operand.vmem [shape: f32[16,128], index: 1, kind: input, shape index: {}]   ;;  %s1656_s2 = inlined_call_operand.hbm [shape: f32[1,32,128], index: 2, kind: input, shape index: {}]   ;;  %s1657_s3 = inlined_call_operand.vmem [shape: f32[2,32,128], index: 3, kind: input, shape index: {}]   ;;  %s1658_s4 = inlined_call_operand.vmem [shape: f32[2,1,128], index: 4, kind: input, shape index: {}]   ;;  %s1659_s5 = inlined_call_operand.hbm [shape: f32[2,8,32], index: 5, kind: output, shape index: {0}]   ;;  %s1660_s6 = inlined_call_operand.hbm [shape: f32[2,8,32], index: 6, kind: output, shape index: {1}]  }
   0x1   :  { %13 = vsyncpa [#allocation6], 0 }
   0x2   :  { %14 = vsyncpa [#allocation9], 0  ;;  %s23_s23 = sshll.u32 %s1656_s2, 4  ;;  %s1313_s24 = smov [#allocation4]   ;;  %s24_s23 = int_to_ptr.hbm [resolvable:$true] %s23_s23 }
   0x3   :  { %s25_s25 = sshll.u32 %s1313_s24, 4  ;;  %s1314_s26 = smov 128   ;;  %s26_s25 = int_to_ptr.vmem [resolvable:$true] %s25_s25 }
   0x4   :  { %s1315_s27 = smov 8  }
   0x5   :  { %31 = dma.hbm_to_vmem [thread:$0]  %s24_s23, 512, %s26_s25, [#allocation5], %s1314_s26, %s1314_s26, %s1315_s27  }
   0x6   :  { %1307 = dma.done.wait [#allocation5], 512  }
   0x7   :  { %1308 = vsyncadd [#allocation5], 4294966784  ;;  %v1366_v0 = vld [vmem:[%s1657_s3 + $0x18] sm:$0xff]  ;;  %v49_v1 = vld [vmem:[%s1655_s1 + $0x8] sm:$0xff]  ;;  %vm54_vm0 = vcmask 130048   ;;  %v1316_v7 = vmov 0.0  }
   0x8   :  { %v1374_v2 = vld [vmem:[%s1657_s3 + $0x10] sm:$0xff]  ;;  %149 = vmatpush.msra.mxu1 %v1366_v0  ;;  %93 = vmatpush.msra.mxu0 %v49_v1  ;;  %v48_v3 = vld [vmem:[%s1655_s1] sm:$0xff]  ;;  %v1386_v5 = vld [vmem:[%s1657_s3 + $0x8] sm:$0xff]  ;;  %s1317_s18 = smov 64   ;;  %s1318_s19 = smov 32   ;;  %vm133_vm1 = vcmask 261120  }
   0x9   :  { %v40_v4 = vld [vmem:[%s1654_s0] sm:$0xff]  ;;  %201 = vmatpush.msra.mxu2 %v1366_v0  ;;  %v573_v26 = vld [vmem:[#allocation4 + $0x18] sm:$0xff]  ;;  %v572_v27 = vld [vmem:[#allocation4 + $0x10] sm:$0xff]  ;;  %s1320_s20 = smov [#allocation8]   ;;  %s1075_s24 = sshll.u32 %s1660_s6, 4  ;;  %s1076_s24 = int_to_ptr.hbm [resolvable:$true] %s1075_s24 }
   0xa   :  { %150 = vmatpush.msra.mxu1 %v1374_v2  ;;  %94 = vmatpush.msra.mxu0 %v48_v3  ;;  %v1394_v6 = vld [vmem:[%s1657_s3] sm:$0xff]  ;;  %v41_v28 = vld [vmem:[%s1654_s0 + $0x8] sm:$0xff]  ;;  %v42_v48 = vld [vmem:[%s1654_s0 + $0x10] sm:$0xff]  ;;  %s1073_s21 = sshll.u32 %s1320_s20, 4  ;;  %s1074_s21 = int_to_ptr.vmem [resolvable:$true] %s1073_s21 }
   0xb   :  { %1093 = vmatmul.msk.f32.vlgmr.msra.gmra.mxu0 %vm54_vm0, %v40_v4  ;;  %202 = vmatpush.msra.mxu2 %v1374_v2  ;;  %v1417_v8 = vld [vmem:[%s1658_s4] ss:$0 sm:$0xff]  ;;  %v571_v29 = vld [vmem:[#allocation4 + $0x8] sm:$0xff] }
   0xc   :  { %151 = vmatpush.msra.mxu1 %v1386_v5  ;;  %615 = vmatpush.msra.mxu3 %v573_v26  ;;  %v570_v30 = vld [vmem:[#allocation4] sm:$0xff] }
   0xd   :  { %203 = vmatpush.msra.mxu2 %v1386_v5 }
   0xe   :  { %152 = vmatpush.msra.mxu1 %v1394_v6  ;;  %616 = vmatpush.msra.mxu3 %v572_v27 }
   0xf   :  { %153 = vmatmul.f32.vlgmr.msra.gmra.mxu1 %v1316_v7  ;;  %204 = vmatpush.msra.mxu2 %v1394_v6 }
  0x10   :  { %254 = vmatpush.msrb.mxu1 %v1366_v0  ;;  %617 = vmatpush.msra.mxu3 %v571_v29 }
  0x11   :  { %360 = vmatpush.msrb.mxu2 %v1366_v0 }
  0x12   :  { %255 = vmatpush.msrb.mxu1 %v1374_v2  ;;  %618 = vmatpush.msra.mxu3 %v570_v30 }
  0x13   :  { %361 = vmatpush.msrb.mxu2 %v1374_v2  ;;  %1094 = vmatmul.msk.f32.gmra.mxu0 %vm54_vm0, %v41_v28 }
  0x14   :  { %256 = vmatpush.msrb.mxu1 %v1386_v5 }
  0x15   :  { %362 = vmatpush.msrb.mxu2 %v1386_v5 }
  0x16   :  { %257 = vmatpush.msrb.mxu1 %v1394_v6 }
  0x17   :  { %363 = vmatpush.msrb.mxu2 %v1394_v6 }
  0x18   :  { %307 = vmatpush.msra.mxu1 %v1366_v0 }
  0x1a   :  { %308 = vmatpush.msra.mxu1 %v1374_v2 }
  0x1b   :  { %1095 = vmatmul.msk.f32.gmra.mxu0 %vm54_vm0, %v42_v48  ;;  %v45_v48 = vld [vmem:[%s1654_s0 + $0x28] sm:$0xff] }
  0x1c   :  { %309 = vmatpush.msra.mxu1 %v1386_v5 }
  0x1e   :  { %310 = vmatpush.msra.mxu1 %v1394_v6 }
  0x88   :  { %v96_v9 = vpop.f32.mrf.mxu0 }
  0x89   :  { %v97_v10 = vadd.f32 %v1417_v8, %v96_v9 }
  0x8c   :  { %v154_v11 = vpop.f32.mrf.mxu1 }
  0x8d   :  { %v157_v12 = vadd.f32 %v154_v11, %v97_v10  ;;  %v43_v10 = vld [vmem:[%s1654_s0 + $0x18] sm:$0xff] }
  0x8e   :  { %1096 = vmatmul.msk.f32.gmra.mxu0 %vm54_vm0, %v43_v10 }
  0x8f   :  { %1139 = vtanh.f32 %v157_v12  ;;  %v158_v14 = vmul.f32 0.5, %v157_v12 }
  0x90   :  { %v99_v33 = vpop.f32.mrf.mxu0 }
  0x91   :  { %1141 = vtanh.f32 %v158_v14  ;;  %v100_v34 = vadd.f32 %v1417_v8, %v99_v33 }
  0x95   :  { %v1140_v13 = vpop.eup %1139 }
  0x96   :  { %165 = vrot.lane.b32.xlu0 %v1140_v13, %s1317_s18 }
  0x97   :  { %v1142_v15 = vpop.eup %1141 }
  0x98   :  { %v160_v16 = vmul.f32 0.5, %v1142_v15  ;;  %v102_v53 = vpop.f32.mrf.mxu0 }
  0x99   :  { %v103_v54 = vadd.f32 %v1417_v8, %v102_v53 }
  0x9a   :  { %v161_v17 = vadd.f32 0.5, %v160_v16 }
  0x9c   :  { %v163_v20 = vmul.f32 0.0, %v161_v17 }
 0x108   :  { %v166_v18 = vpop.permute.xlu0 %165 }
 0x109   :  { %v168_v19 = vmul.f32 %v166_v18, %v161_v17 }
 0x10b   :  { %170 = vrot.lane.b32.xlu0 %v168_v19, %s1318_s19  ;;  %v105_v15 = vpop.f32.mrf.mxu0 }
 0x10c   :  { %v106_v16 = vadd.f32 %v1417_v8, %v105_v15 }
 0x17d   :  { %v171_v21 = vpop.permute.xlu0 %170 }
 0x17e   :  { %v173_v22 = vadd.f32 %v171_v21, %v163_v20 }
 0x180   :  { %1143 = vtanh.f32 %v173_v22 }
 0x186   :  { %v1144_v23 = vpop.eup %1143 }
 0x187   :  { %176 = vrot.lane.b32.xlu1 %v1144_v23, %s1317_s18 }
 0x1f9   :  { %v177_v24 = vpop.permute.xlu1 %176 }
 0x1fa   :  { %v179_v25 = vmul.f32 %v177_v24, %v161_v17 }
 0x1fc   :  { %181 = vrot.lane.b32.xlu1 %v179_v25, %s1318_s19 }
 0x26e   :  { %v182_v31 = vpop.permute.xlu1 %181 }
 0x26f   :  { %184 = vst.msk [vmem:[#allocation3] sm:$0xff] %vm133_vm1, %v182_v31  ;;  %1101 = vmatmul.msk.f32.vlgmr.msra.gmra.mxu2 %vm133_vm1, %v182_v31 }
 0x270   :  { %413 = vmatpush.msra.mxu2 %v1366_v0 }
 0x272   :  { %414 = vmatpush.msra.mxu2 %v1374_v2 }
 0x274   :  { %415 = vmatpush.msra.mxu2 %v1386_v5 }
 0x276   :  { %v562_v32 = vld [vmem:[#allocation3] sm:$0xff]  ;;  %416 = vmatpush.msra.mxu2 %v1394_v6 }
 0x277   :  { %1109 = vmatmul.msk.f32.vlgmr.msra.gmra.mxu3 %vm133_vm1, %v562_v32  ;;  %v44_v32 = vld [vmem:[%s1654_s0 + $0x20] sm:$0xff] }
 0x278   :  { %1097 = vmatmul.msk.f32.gmra.mxu0 %vm54_vm0, %v44_v32 }
 0x280   :  { %1098 = vmatmul.msk.f32.gmra.mxu0 %vm54_vm0, %v45_v48 }
 0x2f2   :  { %v206_v35 = vpop.f32.mrf.mxu2 }
 0x2f3   :  { %v209_v36 = vadd.f32 %v206_v35, %v100_v34 }
 0x2f5   :  { %1145 = vtanh.f32 %v209_v36  ;;  %v210_v38 = vmul.f32 0.5, %v209_v36  ;;  %v108_v35 = vpop.f32.mrf.mxu0 }
 0x2f6   :  { %v109_v36 = vadd.f32 %v1417_v8, %v108_v35 }
 0x2f7   :  { %1147 = vtanh.f32 %v210_v38 }
 0x2fb   :  { %v1146_v37 = vpop.eup %1145 }
 0x2fc   :  { %217 = vrot.lane.b32.xlu2 %v1146_v37, %s1317_s18 }
 0x2fd   :  { %v1148_v39 = vpop.eup %1147 }
 0x2fe   :  { %v212_v40 = vmul.f32 0.5, %v1148_v39 }
 0x300   :  { %v213_v41 = vadd.f32 0.5, %v212_v40 }
 0x302   :  { %v215_v44 = vmul.f32 %v213_v41, %v173_v22 }
 0x356   :  { %v218_v42 = vpop.permute.xlu2 %217 }
 0x357   :  { %v220_v43 = vmul.f32 %v218_v42, %v213_v41 }
 0x359   :  { %222 = vrot.lane.b32.xlu2 %v220_v43, %s1318_s19 }
 0x3b3   :  { %v223_v45 = vpop.permute.xlu2 %222 }
 0x3b4   :  { %v225_v46 = vadd.f32 %v223_v45, %v215_v44 }
 0x3b6   :  { %1149 = vtanh.f32 %v225_v46 }
 0x3bc   :  { %v1150_v47 = vpop.eup %1149 }
 0x3bd   :  { %228 = vrot.lane.b32.xlu0 %v1150_v47, %s1317_s18 }
 0x42f   :  { %v229_v49 = vpop.permute.xlu0 %228 }
 0x430   :  { %v231_v50 = vmul.f32 %v229_v49, %v213_v41 }
 0x432   :  { %233 = vrot.lane.b32.xlu1 %v231_v50, %s1318_s19 }
 0x4a4   :  { %v234_v51 = vpop.permute.xlu1 %233 }
 0x4a5   :  { %237 = vst.msk [vmem:[#allocation3 + $0x8] sm:$0xff] %vm133_vm1, %v234_v51  ;;  %1102 = vmatmul.msk.f32.vlgmr.msrb.gmra.mxu1 %vm133_vm1, %v234_v51  ;;  %v111_v51 = vpop.f32.mrf.mxu0 }
 0x4a6   :  { %466 = vmatpush.msrb.mxu1 %v1366_v0 }
 0x4a8   :  { %467 = vmatpush.msrb.mxu1 %v1374_v2 }
 0x4aa   :  { %468 = vmatpush.msrb.mxu1 %v1386_v5 }
 0x4ac   :  { %v563_v52 = vld [vmem:[#allocation3 + $0x8] sm:$0xff]  ;;  %469 = vmatpush.msrb.mxu1 %v1394_v6 }
 0x4ad   :  { %1110 = vmatmul.msk.f32.gmra.mxu3 %vm133_vm1, %v563_v52  ;;  %v112_v52 = vadd.f32 %v1417_v8, %v111_v51 }
 0x522   :  { %v259_v55 = vpop.f32.mrf.mxu1 }
 0x523   :  { %v262_v56 = vadd.f32 %v259_v55, %v103_v54 }
 0x525   :  { %1151 = vtanh.f32 %v262_v56  ;;  %v263_v58 = vmul.f32 0.5, %v262_v56 }
 0x527   :  { %1153 = vtanh.f32 %v263_v58 }
 0x52b   :  { %v1152_v57 = vpop.eup %1151 }
 0x52c   :  { %270 = vrot.lane.b32.xlu2 %v1152_v57, %s1317_s18 }
 0x52d   :  { %v1154_v59 = vpop.eup %1153 }
 0x52e   :  { %v265_v60 = vmul.f32 0.5, %v1154_v59 }
 0x530   :  { %v266_v61 = vadd.f32 0.5, %v265_v60 }
 0x532   :  { %v268_v1 = vmul.f32 %v266_v61, %v225_v46 }
 0x586   :  { %v271_v62 = vpop.permute.xlu2 %270 }
 0x587   :  { %v273_v63 = vmul.f32 %v271_v62, %v266_v61 }
 0x589   :  { %275 = vrot.lane.b32.xlu0 %v273_v63, %s1318_s19 }
 0x5fb   :  { %v276_v3 = vpop.permute.xlu0 %275 }
 0x5fc   :  { %v278_v4 = vadd.f32 %v276_v3, %v268_v1 }
 0x5fe   :  { %1155 = vtanh.f32 %v278_v4 }
 0x604   :  { %v1156_v9 = vpop.eup %1155 }
 0x605   :  { %281 = vrot.lane.b32.xlu1 %v1156_v9, %s1317_s18 }
 0x677   :  { %v282_v11 = vpop.permute.xlu1 %281 }
 0x678   :  { %v284_v12 = vmul.f32 %v282_v11, %v266_v61  ;;  %v1506_v11 = vld [vmem:[%s1657_s3 + $0x38] sm:$0xff] }
 0x67a   :  { %286 = vrot.lane.b32.xlu2 %v284_v12, %s1318_s19  ;;  %v1511_v12 = vld [vmem:[%s1657_s3 + $0x30] sm:$0xff] }
 0x6d4   :  { %v287_v13 = vpop.permute.xlu2 %286 }
 0x6d5   :  { %290 = vst.msk [vmem:[#allocation3 + $0x10] sm:$0xff] %vm133_vm1, %v287_v13  ;;  %1103 = vmatmul.msk.f32.vlgmr.msra.gmra.mxu1 %vm133_vm1, %v287_v13  ;;  %v1518_v13 = vld [vmem:[%s1657_s3 + $0x28] sm:$0xff] }
 0x6d6   :  { %670 = vmatpush.msra.mxu1 %v1506_v11 }
 0x6d8   :  { %671 = vmatpush.msra.mxu1 %v1511_v12 }
 0x6da   :  { %672 = vmatpush.msra.mxu1 %v1518_v13 }
 0x6dc   :  { %v564_v14 = vld [vmem:[#allocation3 + $0x10] sm:$0xff] }
 0x6dd   :  { %1111 = vmatmul.msk.f32.gmra.mxu3 %vm133_vm1, %v564_v14  ;;  %v1525_v14 = vld [vmem:[%s1657_s3 + $0x20] sm:$0xff] }
 0x6de   :  { %673 = vmatpush.msra.mxu1 %v1525_v14 }
 0x752   :  { %v312_v17 = vpop.f32.mrf.mxu1 }
 0x753   :  { %v315_v18 = vadd.f32 %v312_v17, %v106_v16 }
 0x755   :  { %1157 = vtanh.f32 %v315_v18  ;;  %v316_v20 = vmul.f32 0.5, %v315_v18 }
 0x757   :  { %1159 = vtanh.f32 %v316_v20 }
 0x75b   :  { %v1158_v19 = vpop.eup %1157 }
 0x75c   :  { %323 = vrot.lane.b32.xlu0 %v1158_v19, %s1317_s18 }
 0x75d   :  { %v1160_v21 = vpop.eup %1159 }
 0x75e   :  { %v318_v22 = vmul.f32 0.5, %v1160_v21  ;;  %v1547_v21 = vld [vmem:[%s1658_s4 + $0x1] ss:$0 sm:$0xff] }
 0x760   :  { %v319_v23 = vadd.f32 0.5, %v318_v22 }
 0x762   :  { %v321_v26 = vmul.f32 %v319_v23, %v278_v4  ;;  %v46_v4 = vld [vmem:[%s1654_s0 + $0x30] sm:$0xff] }
 0x763   :  { %1099 = vmatmul.msk.f32.gmra.mxu0 %vm54_vm0, %v46_v4 }
 0x7ce   :  { %v324_v24 = vpop.permute.xlu0 %323 }
 0x7cf   :  { %v326_v25 = vmul.f32 %v324_v24, %v319_v23 }
 0x7d1   :  { %328 = vrot.lane.b32.xlu1 %v326_v25, %s1318_s19 }
 0x7e0   :  { %v114_v17 = vpop.f32.mrf.mxu0 }
 0x7e1   :  { %v115_v18 = vadd.f32 %v1417_v8, %v114_v17 }
 0x843   :  { %v329_v27 = vpop.permute.xlu1 %328 }
 0x844   :  { %v331_v28 = vadd.f32 %v329_v27, %v321_v26 }
 0x846   :  { %1161 = vtanh.f32 %v331_v28 }
 0x84c   :  { %v1162_v29 = vpop.eup %1161 }
 0x84d   :  { %334 = vrot.lane.b32.xlu2 %v1162_v29, %s1317_s18 }
 0x8a7   :  { %v335_v30 = vpop.permute.xlu2 %334 }
 0x8a8   :  { %v337_v31 = vmul.f32 %v335_v30, %v319_v23 }
 0x8aa   :  { %339 = vrot.lane.b32.xlu0 %v337_v31, %s1318_s19 }
 0x91c   :  { %v340_v33 = vpop.permute.xlu0 %339 }
 0x91d   :  { %343 = vst.msk [vmem:[#allocation3 + $0x18] sm:$0xff] %vm133_vm1, %v340_v33  ;;  %1104 = vmatmul.msk.f32.vlgmr.msrb.gmra.mxu2 %vm133_vm1, %v340_v33 }
 0x91e   :  { %519 = vmatpush.msrb.mxu2 %v1366_v0 }
 0x920   :  { %520 = vmatpush.msrb.mxu2 %v1374_v2 }
 0x922   :  { %521 = vmatpush.msrb.mxu2 %v1386_v5 }
 0x924   :  { %v565_v34 = vld [vmem:[#allocation3 + $0x18] sm:$0xff]  ;;  %522 = vmatpush.msrb.mxu2 %v1394_v6 }
 0x925   :  { %1112 = vmatmul.msk.f32.gmra.mxu3 %vm133_vm1, %v565_v34 }
 0x9a0   :  { %v365_v37 = vpop.f32.mrf.mxu2 }
 0x9a1   :  { %v368_v38 = vadd.f32 %v365_v37, %v109_v36 }
 0x9a3   :  { %1163 = vtanh.f32 %v368_v38  ;;  %v369_v40 = vmul.f32 0.5, %v368_v38 }
 0x9a5   :  { %1165 = vtanh.f32 %v369_v40 }
 0x9a9   :  { %v1164_v39 = vpop.eup %1163 }
 0x9aa   :  { %376 = vrot.lane.b32.xlu1 %v1164_v39, %s1317_s18 }
 0x9ab   :  { %v1166_v0 = vpop.eup %1165 }
 0x9ac   :  { %v371_v2 = vmul.f32 0.5, %v1166_v0 }
 0x9ae   :  { %v372_v41 = vadd.f32 0.5, %v371_v2 }
 0x9b0   :  { %v374_v6 = vmul.f32 %v372_v41, %v331_v28 }
 0xa1c   :  { %v377_v5 = vpop.permute.xlu1 %376 }
 0xa1d   :  { %v379_v42 = vmul.f32 %v377_v5, %v372_v41 }
 0xa1f   :  { %381 = vrot.lane.b32.xlu2 %v379_v42, %s1318_s19 }
 0xa79   :  { %v382_v43 = vpop.permute.xlu2 %381 }
 0xa7a   :  { %v384_v44 = vadd.f32 %v382_v43, %v374_v6 }
 0xa7c   :  { %1167 = vtanh.f32 %v384_v44 }
 0xa82   :  { %v1168_v45 = vpop.eup %1167 }
 0xa83   :  { %387 = vrot.lane.b32.xlu0 %v1168_v45, %s1317_s18 }
 0xaf5   :  { %v388_v46 = vpop.permute.xlu0 %387 }
 0xaf6   :  { %v390_v47 = vmul.f32 %v388_v46, %v372_v41 }
 0xaf8   :  { %392 = vrot.lane.b32.xlu1 %v390_v47, %s1318_s19  ;;  %v47_v47 = vld [vmem:[%s1654_s0 + $0x38] sm:$0xff]  ;;  %s1319_s0 = smov 96  }
 0xaf9   :  { %1100 = vmatmul.msk.f32.gmra.mxu0 %vm54_vm0, %v47_v47 }
 0xb6a   :  { %v393_v49 = vpop.permute.xlu1 %392 }
 0xb6b   :  { %396 = vst.msk [vmem:[#allocation3 + $0x20] sm:$0xff] %vm133_vm1, %v393_v49  ;;  %1105 = vmatmul.msk.f32.vlgmr.msra.gmra.mxu2 %vm133_vm1, %v393_v49 }
 0xb6c   :  { %719 = vmatpush.msra.mxu2 %v1506_v11 }
 0xb6e   :  { %720 = vmatpush.msra.mxu2 %v1511_v12 }
 0xb70   :  { %721 = vmatpush.msra.mxu2 %v1518_v13 }
 0xb72   :  { %v566_v50 = vld [vmem:[#allocation3 + $0x20] sm:$0xff]  ;;  %722 = vmatpush.msra.mxu2 %v1525_v14 }
 0xb73   :  { %1113 = vmatmul.msk.f32.gmra.mxu3 %vm133_vm1, %v566_v50 }
 0xbee   :  { %v418_v53 = vpop.f32.mrf.mxu2 }
 0xbef   :  { %v421_v54 = vadd.f32 %v418_v53, %v112_v52 }
 0xbf1   :  { %1169 = vtanh.f32 %v421_v54  ;;  %v422_v56 = vmul.f32 0.5, %v421_v54 }
 0xbf3   :  { %1171 = vtanh.f32 %v422_v56 }
 0xbf7   :  { %v1170_v55 = vpop.eup %1169 }
 0xbf8   :  { %429 = vrot.lane.b32.xlu2 %v1170_v55, %s1317_s18 }
 0xbf9   :  { %v1172_v57 = vpop.eup %1171 }
 0xbfa   :  { %v424_v58 = vmul.f32 0.5, %v1172_v57 }
 0xbfc   :  { %v425_v59 = vadd.f32 0.5, %v424_v58 }
 0xbfe   :  { %v427_v62 = vmul.f32 %v425_v59, %v384_v44 }
 0xc52   :  { %v430_v60 = vpop.permute.xlu2 %429 }
 0xc53   :  { %v432_v61 = vmul.f32 %v430_v60, %v425_v59 }
 0xc55   :  { %434 = vrot.lane.b32.xlu0 %v432_v61, %s1318_s19 }
 0xcc7   :  { %v435_v63 = vpop.permute.xlu0 %434 }
 0xcc8   :  { %v1494_v1 = vadd.f32 %v435_v63, %v427_v62 }
 0xcca   :  { %1173 = vtanh.f32 %v1494_v1 }
 0xcd0   :  { %v1174_v3 = vpop.eup %1173 }
 0xcd1   :  { %440 = vrot.lane.b32.xlu1 %v1174_v3, %s1317_s18 }
 0xd43   :  { %v441_v9 = vpop.permute.xlu1 %440 }
 0xd44   :  { %v443_v10 = vmul.f32 %v441_v9, %v425_v59 }
 0xd46   :  { %445 = vrot.lane.b32.xlu2 %v443_v10, %s1318_s19 }
 0xda0   :  { %v446_v15 = vpop.permute.xlu2 %445 }
 0xda1   :  { %449 = vst.msk [vmem:[#allocation3 + $0x28] sm:$0xff] %vm133_vm1, %v446_v15  ;;  %1106 = vmatmul.msk.f32.vlgmr.msrb.gmra.mxu1 %vm133_vm1, %v446_v15 }
 0xda2   :  { %768 = vmatpush.msrb.mxu1 %v1506_v11 }
 0xda4   :  { %769 = vmatpush.msrb.mxu1 %v1511_v12 }
 0xda6   :  { %770 = vmatpush.msrb.mxu1 %v1518_v13 }
 0xda8   :  { %v567_v16 = vld [vmem:[#allocation3 + $0x28] sm:$0xff]  ;;  %771 = vmatpush.msrb.mxu1 %v1525_v14 }
 0xda9   :  { %1114 = vmatmul.msk.f32.gmra.mxu3 %vm133_vm1, %v567_v16  ;;  %674 = vmatmul.f32.vlgmr.msra.gmra.mxu1 %v1316_v7  ;;  %v620_v7 = vpop.f32.mrf.mxu3 }
 0xdaa   :  { %866 = vmatpush.msra.mxu1 %v1506_v11  ;;  %v621_v22 = vadd.f32 %v1547_v21, %v620_v7 }
 0xdac   :  { %867 = vmatpush.msra.mxu1 %v1511_v12 }
 0xdae   :  { %868 = vmatpush.msra.mxu1 %v1518_v13 }
 0xdb0   :  { %869 = vmatpush.msra.mxu1 %v1525_v14 }
 0xdb1   :  { %v623_v52 = vpop.f32.mrf.mxu3 }
 0xdb2   :  { %v624_v53 = vadd.f32 %v1547_v21, %v623_v52 }
 0xdb9   :  { %v626_v16 = vpop.f32.mrf.mxu3 }
 0xdba   :  { %v627_v17 = vadd.f32 %v1547_v21, %v626_v16 }
 0xe1e   :  { %v471_v19 = vpop.f32.mrf.mxu1 }
 0xe1f   :  { %v474_v20 = vadd.f32 %v471_v19, %v115_v18 }
 0xe21   :  { %1175 = vtanh.f32 %v474_v20  ;;  %v475_v27 = vmul.f32 0.5, %v474_v20 }
 0xe26   :  { %v675_v23 = vpop.f32.mrf.mxu1 }
 0xe27   :  { %v1176_v24 = vpop.eup %1175  ;;  %v678_v25 = vadd.f32 %v675_v23, %v621_v22 }
 0xe28   :  { %482 = vrot.lane.b32.xlu0 %v1176_v24, %s1317_s18 }
 0xe29   :  { %1177 = vtanh.f32 %v678_v25  ;;  %v679_v28 = vmul.f32 0.5, %v678_v25 }
 0xe2a   :  { %1179 = vtanh.f32 %v475_v27 }
 0xe2b   :  { %1181 = vtanh.f32 %v679_v28 }
 0xe2f   :  { %v1178_v26 = vpop.eup %1177 }
 0xe30   :  { %686 = vrot.lane.b32.xlu1 %v1178_v26, %s1317_s18  ;;  %v1180_v29 = vpop.eup %1179 }
 0xe31   :  { %v477_v30 = vmul.f32 0.5, %v1180_v29  ;;  %v1182_v32 = vpop.eup %1181 }
 0xe32   :  { %v681_v35 = vmul.f32 0.5, %v1182_v32 }
 0xe33   :  { %v478_v31 = vadd.f32 0.5, %v477_v30 }
 0xe34   :  { %v682_v36 = vadd.f32 0.5, %v681_v35 }
 0xe35   :  { %v480_v39 = vmul.f32 %v478_v31, %v1494_v1 }
 0xe36   :  { %v684_v41 = vmul.f32 0.0, %v682_v36 }
 0xe9a   :  { %v483_v33 = vpop.permute.xlu0 %482 }
 0xe9b   :  { %v485_v34 = vmul.f32 %v483_v33, %v478_v31 }
 0xe9d   :  { %487 = vrot.lane.b32.xlu2 %v485_v34, %s1318_s19  ;;  %v629_v34 = vpop.f32.mrf.mxu3 }
 0xe9e   :  { %v630_v35 = vadd.f32 %v1547_v21, %v629_v34 }
 0xea2   :  { %v687_v37 = vpop.permute.xlu1 %686 }
 0xea3   :  { %v689_v38 = vmul.f32 %v687_v37, %v682_v36 }
 0xea5   :  { %691 = vrot.lane.b32.xlu0 %v689_v38, %s1318_s19 }
 0xef7   :  { %v488_v40 = vpop.permute.xlu2 %487 }
 0xef8   :  { %v1555_v0 = vadd.f32 %v488_v40, %v480_v39 }
 0xefa   :  { %1183 = vtanh.f32 %v1555_v0 }
 0xf00   :  { %v1184_v2 = vpop.eup %1183 }
 0xf01   :  { %493 = vrot.lane.b32.xlu1 %v1184_v2, %s1317_s18 }
 0xf17   :  { %v692_v5 = vpop.permute.xlu0 %691 }
 0xf18   :  { %v694_v42 = vadd.f32 %v692_v5, %v684_v41 }
 0xf1a   :  { %1185 = vtanh.f32 %v694_v42 }
 0xf20   :  { %v1186_v6 = vpop.eup %1185 }
 0xf21   :  { %697 = vrot.lane.b32.xlu2 %v1186_v6, %s1317_s18 }
 0xf73   :  { %v494_v43 = vpop.permute.xlu1 %493 }
 0xf74   :  { %v496_v44 = vmul.f32 %v494_v43, %v478_v31 }
 0xf76   :  { %498 = vrot.lane.b32.xlu0 %v496_v44, %s1318_s19 }
 0xf7b   :  { %v698_v45 = vpop.permute.xlu2 %697 }
 0xf7c   :  { %v700_v46 = vmul.f32 %v698_v45, %v682_v36  ;;  %v632_v45 = vpop.f32.mrf.mxu3 }
 0xf7e   :  { %703 = vrot.lane.b32.xlu1 %v700_v46, %s1318_s19  ;;  %v633_v46 = vadd.f32 %v1547_v21, %v632_v45 }
 0xfe8   :  { %v499_v48 = vpop.permute.xlu0 %498 }
 0xfe9   :  { %502 = vst.msk [vmem:[#allocation3 + $0x30] sm:$0xff] %vm133_vm1, %v499_v48  ;;  %1107 = vmatmul.msk.f32.vlgmr.msrb.gmra.mxu2 %vm133_vm1, %v499_v48 }
 0xfea   :  { %817 = vmatpush.msrb.mxu2 %v1506_v11 }
 0xfec   :  { %818 = vmatpush.msrb.mxu2 %v1511_v12 }
 0xfee   :  { %819 = vmatpush.msrb.mxu2 %v1518_v13 }
 0xff0   :  { %v704_v49 = vpop.permute.xlu1 %703  ;;  %v568_v50 = vld [vmem:[#allocation3 + $0x30] sm:$0xff]  ;;  %820 = vmatpush.msrb.mxu2 %v1525_v14 }
 0xff1   :  { %1115 = vmatmul.msk.f32.gmra.mxu3 %vm133_vm1, %v568_v50  ;;  %1121 = vmatmul.msk.f32.vlgmr.msra.gmra.mxu2 %vm133_vm1, %v704_v49 }
 0xff2   :  { %915 = vmatpush.msra.mxu2 %v1506_v11 }
 0xff4   :  { %916 = vmatpush.msra.mxu2 %v1511_v12 }
 0xff6   :  { %917 = vmatpush.msra.mxu2 %v1518_v13 }
 0xff8   :  { %918 = vmatpush.msra.mxu2 %v1525_v14 }
0x106c   :  { %v1578_v51 = vpop.f32.mrf.mxu2 }
0x1074   :  { %v724_v54 = vpop.f32.mrf.mxu2 }
0x1075   :  { %v727_v55 = vadd.f32 %v724_v54, %v624_v53 }
0x1077   :  { %1187 = vtanh.f32 %v727_v55  ;;  %v728_v57 = vmul.f32 0.5, %v727_v55 }
0x1079   :  { %1189 = vtanh.f32 %v728_v57 }
0x107d   :  { %v1188_v56 = vpop.eup %1187 }
0x107e   :  { %735 = vrot.lane.b32.xlu2 %v1188_v56, %s1317_s18 }
0x107f   :  { %v1190_v58 = vpop.eup %1189 }
0x1080   :  { %v730_v59 = vmul.f32 0.5, %v1190_v58 }
0x1082   :  { %v731_v60 = vadd.f32 0.5, %v730_v59 }
0x1084   :  { %v733_v63 = vmul.f32 %v731_v60, %v694_v42 }
0x10d8   :  { %v736_v61 = vpop.permute.xlu2 %735 }
0x10d9   :  { %v738_v62 = vmul.f32 %v736_v61, %v731_v60 }
0x10db   :  { %740 = vrot.lane.b32.xlu0 %v738_v62, %s1318_s19 }
0x114d   :  { %v741_v1 = vpop.permute.xlu0 %740 }
0x114e   :  { %v743_v3 = vadd.f32 %v741_v1, %v733_v63  ;;  %v635_v1 = vpop.f32.mrf.mxu3 }
0x1150   :  { %1191 = vtanh.f32 %v743_v3 }
0x1156   :  { %v1192_v4 = vpop.eup %1191 }
0x1157   :  { %746 = vrot.lane.b32.xlu1 %v1192_v4, %s1317_s18 }
0x11c9   :  { %v747_v9 = vpop.permute.xlu1 %746 }
0x11ca   :  { %v749_v10 = vmul.f32 %v747_v9, %v731_v60 }
0x11cc   :  { %752 = vrot.lane.b32.xlu2 %v749_v10, %s1318_s19 }
0x1226   :  { %v753_v15 = vpop.permute.xlu2 %752 }
0x1227   :  { %1122 = vmatmul.msk.f32.vlgmr.msrb.gmra.mxu1 %vm133_vm1, %v753_v15 }
0x1228   :  { %964 = vmatpush.msrb.mxu1 %v1506_v11 }
0x122a   :  { %965 = vmatpush.msrb.mxu1 %v1511_v12 }
0x122c   :  { %966 = vmatpush.msrb.mxu1 %v1518_v13 }
0x122e   :  { %967 = vmatpush.msrb.mxu1 %v1525_v14 }
0x12a4   :  { %v773_v18 = vpop.f32.mrf.mxu1 }
0x12a5   :  { %v776_v19 = vadd.f32 %v773_v18, %v627_v17  ;;  %v117_v17 = vpop.f32.mrf.mxu0 }
0x12a7   :  { %1193 = vtanh.f32 %v776_v19  ;;  %v777_v7 = vmul.f32 0.5, %v776_v19  ;;  %v118_v19 = vadd.f32 %v1417_v8, %v117_v17 }
0x12a9   :  { %1195 = vtanh.f32 %v777_v7  ;;  %v527_v7 = vadd.f32 %v1578_v51, %v118_v19 }
0x12ad   :  { %v1194_v20 = vpop.eup %1193 }
0x12ae   :  { %784 = vrot.lane.b32.xlu0 %v1194_v20, %s1317_s18 }
0x12af   :  { %v1196_v22 = vpop.eup %1195 }
0x12b0   :  { %v779_v23 = vmul.f32 0.5, %v1196_v22 }
0x12b2   :  { %v780_v24 = vadd.f32 0.5, %v779_v23 }
0x12b4   :  { %v782_v27 = vmul.f32 %v780_v24, %v743_v3  ;;  %v636_v3 = vadd.f32 %v1547_v21, %v635_v1 }
0x1320   :  { %v785_v25 = vpop.permute.xlu0 %784 }
0x1321   :  { %v787_v26 = vmul.f32 %v785_v25, %v780_v24 }
0x1323   :  { %789 = vrot.lane.b32.xlu1 %v787_v26, %s1318_s19 }
0x1395   :  { %v790_v28 = vpop.permute.xlu1 %789 }
0x1396   :  { %v792_v29 = vadd.f32 %v790_v28, %v782_v27 }
0x1398   :  { %1197 = vtanh.f32 %v792_v29 }
0x139e   :  { %v1198_v30 = vpop.eup %1197 }
0x139f   :  { %795 = vrot.lane.b32.xlu2 %v1198_v30, %s1317_s18 }
0x13f9   :  { %v796_v31 = vpop.permute.xlu2 %795 }
0x13fa   :  { %v798_v32 = vmul.f32 %v796_v31, %v780_v24 }
0x13fc   :  { %801 = vrot.lane.b32.xlu0 %v798_v32, %s1318_s19 }
0x146e   :  { %v802_v33 = vpop.permute.xlu0 %801 }
0x146f   :  { %1123 = vmatmul.msk.f32.vlgmr.msrb.gmra.mxu2 %vm133_vm1, %v802_v33 }
0x1470   :  { %1013 = vmatpush.msrb.mxu2 %v1506_v11 }
0x1472   :  { %1014 = vmatpush.msrb.mxu2 %v1511_v12 }
0x1474   :  { %1015 = vmatpush.msrb.mxu2 %v1518_v13 }
0x1476   :  { %1016 = vmatpush.msrb.mxu2 %v1525_v14 }
0x14f2   :  { %v822_v36 = vpop.f32.mrf.mxu2 }
0x14f3   :  { %v825_v37 = vadd.f32 %v822_v36, %v630_v35  ;;  %v638_v36 = vpop.f32.mrf.mxu3 }
0x14f5   :  { %1199 = vtanh.f32 %v825_v37  ;;  %v826_v39 = vmul.f32 0.5, %v825_v37  ;;  %v639_v37 = vadd.f32 %v1547_v21, %v638_v36 }
0x14f7   :  { %1201 = vtanh.f32 %v826_v39 }
0x14fb   :  { %v1200_v38 = vpop.eup %1199 }
0x14fc   :  { %833 = vrot.lane.b32.xlu1 %v1200_v38, %s1317_s18 }
0x14fd   :  { %v1202_v40 = vpop.eup %1201 }
0x14fe   :  { %v828_v2 = vmul.f32 0.5, %v1202_v40 }
0x1500   :  { %v829_v11 = vadd.f32 0.5, %v828_v2 }
0x1502   :  { %v831_v13 = vmul.f32 %v829_v11, %v792_v29  ;;  %v528_v29 = vmul.f32 0.5, %v527_v7 }
0x156e   :  { %v834_v41 = vpop.permute.xlu1 %833 }
0x156f   :  { %v836_v12 = vmul.f32 %v834_v41, %v829_v11 }
0x1571   :  { %838 = vrot.lane.b32.xlu2 %v836_v12, %s1318_s19 }
0x15cb   :  { %v839_v14 = vpop.permute.xlu2 %838 }
0x15cc   :  { %v841_v5 = vadd.f32 %v839_v14, %v831_v13 }
0x15ce   :  { %1203 = vtanh.f32 %v841_v5 }
0x15d4   :  { %v1204_v42 = vpop.eup %1203 }
0x15d5   :  { %844 = vrot.lane.b32.xlu0 %v1204_v42, %s1317_s18 }
0x1647   :  { %v845_v6 = vpop.permute.xlu0 %844 }
0x1648   :  { %v847_v43 = vmul.f32 %v845_v6, %v829_v11 }
0x164a   :  { %850 = vrot.lane.b32.xlu1 %v847_v43, %s1318_s19 }
0x16bc   :  { %v851_v44 = vpop.permute.xlu1 %850 }
0x16bd   :  { %1124 = vmatmul.msk.f32.vlgmr.msra.gmra.mxu1 %vm133_vm1, %v851_v44 }
0x173a   :  { %v871_v47 = vpop.f32.mrf.mxu1 }
0x173b   :  { %v874_v48 = vadd.f32 %v871_v47, %v633_v46 }
0x173d   :  { %1205 = vtanh.f32 %v874_v48  ;;  %v875_v50 = vmul.f32 0.5, %v874_v48 }
0x173f   :  { %1207 = vtanh.f32 %v875_v50 }
0x1743   :  { %v1206_v49 = vpop.eup %1205 }
0x1744   :  { %882 = vrot.lane.b32.xlu2 %v1206_v49, %s1317_s18 }
0x1745   :  { %v1208_v52 = vpop.eup %1207 }
0x1746   :  { %v877_v53 = vmul.f32 0.5, %v1208_v52 }
0x1748   :  { %v878_v54 = vadd.f32 0.5, %v877_v53 }
0x174a   :  { %v880_v57 = vmul.f32 %v878_v54, %v841_v5 }
0x179e   :  { %v883_v55 = vpop.permute.xlu2 %882 }
0x179f   :  { %v885_v56 = vmul.f32 %v883_v55, %v878_v54 }
0x17a1   :  { %887 = vrot.lane.b32.xlu0 %v885_v56, %s1318_s19 }
0x1813   :  { %v888_v58 = vpop.permute.xlu0 %887 }
0x1814   :  { %v890_v59 = vadd.f32 %v888_v58, %v880_v57 }
0x1816   :  { %1209 = vtanh.f32 %v890_v59 }
0x181c   :  { %v1210_v60 = vpop.eup %1209 }
0x181d   :  { %893 = vrot.lane.b32.xlu1 %v1210_v60, %s1317_s18 }
0x188f   :  { %v894_v61 = vpop.permute.xlu1 %893 }
0x1890   :  { %v896_v62 = vmul.f32 %v894_v61, %v878_v54 }
0x1892   :  { %899 = vrot.lane.b32.xlu2 %v896_v62, %s1318_s19 }
0x18ec   :  { %v900_v63 = vpop.permute.xlu2 %899 }
0x18ed   :  { %1125 = vmatmul.msk.f32.vlgmr.msra.gmra.mxu2 %vm133_vm1, %v900_v63 }
0x1970   :  { %v920_v4 = vpop.f32.mrf.mxu2 }
0x1971   :  { %v923_v9 = vadd.f32 %v920_v4, %v636_v3 }
0x1973   :  { %1211 = vtanh.f32 %v923_v9  ;;  %v924_v15 = vmul.f32 0.5, %v923_v9 }
0x1975   :  { %1213 = vtanh.f32 %v924_v15 }
0x1976   :  { %1215 = vtanh.f32 %v527_v7 }
0x1979   :  { %v1212_v10 = vpop.eup %1211 }
0x197a   :  { %931 = vrot.lane.b32.xlu0 %v1212_v10, %s1317_s18 }
0x197b   :  { %v1214_v16 = vpop.eup %1213 }
0x197c   :  { %v926_v18 = vmul.f32 0.5, %v1214_v16  ;;  %v1216_v24 = vpop.eup %1215 }
0x197e   :  { %v927_v20 = vadd.f32 0.5, %v926_v18 }
0x1980   :  { %v929_v25 = vmul.f32 %v927_v20, %v890_v59 }
0x19ec   :  { %v932_v22 = vpop.permute.xlu0 %931 }
0x19ed   :  { %v934_v23 = vmul.f32 %v932_v22, %v927_v20 }
0x19ef   :  { %936 = vrot.lane.b32.xlu1 %v934_v23, %s1318_s19 }
0x19f7   :  { %535 = vrot.lane.b32.xlu1 %v1216_v24, %s1317_s18 }
0x1a61   :  { %v937_v26 = vpop.permute.xlu1 %936 }
0x1a62   :  { %v939_v27 = vadd.f32 %v937_v26, %v929_v25 }
0x1a64   :  { %1217 = vtanh.f32 %v939_v27 }
0x1a65   :  { %1219 = vtanh.f32 %v528_v29 }
0x1a69   :  { %v536_v32 = vpop.permute.xlu1 %535 }
0x1a6a   :  { %v1218_v28 = vpop.eup %1217 }
0x1a6b   :  { %942 = vrot.lane.b32.xlu2 %v1218_v28, %s1317_s18  ;;  %v1220_v8 = vpop.eup %1219 }
0x1a6c   :  { %v530_v31 = vmul.f32 0.5, %v1220_v8 }
0x1a6e   :  { %v531_v33 = vadd.f32 0.5, %v530_v31 }
0x1a70   :  { %v538_v34 = vmul.f32 %v536_v32, %v531_v33  ;;  %v533_v2 = vmul.f32 %v531_v33, %v1555_v0 }
0x1ac5   :  { %v943_v30 = vpop.permute.xlu2 %942 }
0x1ac6   :  { %v945_v51 = vmul.f32 %v943_v30, %v927_v20 }
0x1ac8   :  { %948 = vrot.lane.b32.xlu0 %v945_v51, %s1318_s19 }
0x1ad0   :  { %540 = vrot.lane.b32.xlu0 %v538_v34, %s1318_s19 }
0x1b3a   :  { %v949_v35 = vpop.permute.xlu0 %948 }
0x1b3b   :  { %1126 = vmatmul.msk.f32.vlgmr.msrb.gmra.mxu1 %vm133_vm1, %v949_v35 }
0x1b42   :  { %v541_v40 = vpop.permute.xlu0 %540 }
0x1b43   :  { %v543_v11 = vadd.f32 %v541_v40, %v533_v2 }
0x1bb8   :  { %v969_v38 = vpop.f32.mrf.mxu1 }
0x1bb9   :  { %v972_v39 = vadd.f32 %v969_v38, %v639_v37 }
0x1bbb   :  { %1221 = vtanh.f32 %v972_v39  ;;  %v973_v13 = vmul.f32 0.5, %v972_v39 }
0x1bbc   :  { %1223 = vtanh.f32 %v543_v11 }
0x1bbd   :  { %1225 = vtanh.f32 %v973_v13 }
0x1bc1   :  { %v1222_v41 = vpop.eup %1221 }
0x1bc2   :  { %980 = vrot.lane.b32.xlu2 %v1222_v41, %s1317_s18  ;;  %v1224_v12 = vpop.eup %1223 }
0x1bc3   :  { %v1226_v14 = vpop.eup %1225 }
0x1bc4   :  { %v975_v5 = vmul.f32 0.5, %v1226_v14 }
0x1bc6   :  { %v976_v42 = vadd.f32 0.5, %v975_v5 }
0x1bc8   :  { %v978_v0 = vmul.f32 %v976_v42, %v939_v27 }
0x1bca   :  { %546 = vrot.lane.b32.xlu2 %v1224_v12, %s1317_s18 }
0x1c1c   :  { %v981_v6 = vpop.permute.xlu2 %980 }
0x1c1d   :  { %v983_v43 = vmul.f32 %v981_v6, %v976_v42 }
0x1c1f   :  { %985 = vrot.lane.b32.xlu1 %v983_v43, %s1318_s19 }
0x1c24   :  { %v547_v44 = vpop.permute.xlu2 %546 }
0x1c25   :  { %v549_v45 = vmul.f32 %v547_v44, %v531_v33 }
0x1c27   :  { %551 = vrot.lane.b32.xlu1 %v549_v45, %s1318_s19 }
0x1c91   :  { %v986_v46 = vpop.permute.xlu1 %985 }
0x1c92   :  { %v988_v47 = vadd.f32 %v986_v46, %v978_v0 }
0x1c94   :  { %1227 = vtanh.f32 %v988_v47 }
0x1c99   :  { %v552_v48 = vpop.permute.xlu1 %551 }
0x1c9a   :  { %v1228_v49 = vpop.eup %1227  ;;  %555 = vst.msk [vmem:[#allocation3 + $0x38] sm:$0xff] %vm133_vm1, %v552_v48 }
0x1c9b   :  { %556 = vst.msk [vmem:[#allocation7] sm:$0xff] %vm133_vm1, %v552_v48  ;;  %991 = vrot.lane.b32.xlu0 %v1228_v49, %s1317_s18 }
0x1ca1   :  { %v569_v50 = vld [vmem:[#allocation3 + $0x38] sm:$0xff] }
0x1ca2   :  { %1116 = vmatmul.msk.f32.gmra.mxu3 %vm133_vm1, %v569_v50 }
0x1d0d   :  { %v992_v52 = vpop.permute.xlu0 %991 }
0x1d0e   :  { %v994_v53 = vmul.f32 %v992_v52, %v976_v42 }
0x1d10   :  { %997 = vrot.lane.b32.xlu2 %v994_v53, %s1318_s19 }
0x1d25   :  { %v641_v55 = vpop.f32.mrf.mxu3 }
0x1d26   :  { %v642_v56 = vadd.f32 %v1547_v21, %v641_v55 }
0x1d6a   :  { %v998_v54 = vpop.permute.xlu2 %997 }
0x1d6b   :  { %1127 = vmatmul.msk.f32.vlgmr.msrb.gmra.mxu2 %vm133_vm1, %v998_v54 }
0x1dee   :  { %v1018_v57 = vpop.f32.mrf.mxu2 }
0x1def   :  { %v1021_v58 = vadd.f32 %v1018_v57, %v642_v56 }
0x1df1   :  { %1229 = vtanh.f32 %v1021_v58  ;;  %v1022_v60 = vmul.f32 0.5, %v1021_v58 }
0x1df3   :  { %1231 = vtanh.f32 %v1022_v60 }
0x1df7   :  { %v1230_v59 = vpop.eup %1229 }
0x1df8   :  { %1029 = vrot.lane.b32.xlu0 %v1230_v59, %s1317_s18 }
0x1df9   :  { %v1232_v61 = vpop.eup %1231 }
0x1dfa   :  { %v1024_v62 = vmul.f32 0.5, %v1232_v61 }
0x1dfc   :  { %v1025_v63 = vadd.f32 0.5, %v1024_v62 }
0x1dfe   :  { %v1027_v21 = vmul.f32 %v1025_v63, %v988_v47 }
0x1e00   :  { %558 = vrot.lane.b32.xlu0 %v543_v11, %s1319_s0 }
0x1e6a   :  { %v1030_v1 = vpop.permute.xlu0 %1029 }
0x1e6b   :  { %v1032_v3 = vmul.f32 %v1030_v1, %v1025_v63 }
0x1e6d   :  { %1034 = vrot.lane.b32.xlu1 %v1032_v3, %s1318_s19 }
0x1e72   :  { %v559_v4 = vpop.permute.xlu0 %558 }
0x1e73   :  { %561 = vst.msk [vmem:[#allocation8] sm:$0xff] %vm133_vm1, %v559_v4 }
0x1edf   :  { %v1035_v9 = vpop.permute.xlu1 %1034 }
0x1ee0   :  { %v1037_v10 = vadd.f32 %v1035_v9, %v1027_v21 }
0x1ee2   :  { %1233 = vtanh.f32 %v1037_v10 }
0x1ee8   :  { %v1234_v15 = vpop.eup %1233 }
0x1ee9   :  { %1040 = vrot.lane.b32.xlu2 %v1234_v15, %s1317_s18  ;;  %s1321_s18 = smov [#allocation7]  }
0x1eea   :  { %s1060_s25 = sshll.u32 %s1321_s18, 4  ;;  %s1061_s25 = int_to_ptr.vmem [resolvable:$true] %s1060_s25 }
0x1ef1   :  { %1051 = vrot.lane.b32.xlu2 %v1037_v10, %s1319_s0 }
0x1f43   :  { %v1041_v16 = vpop.permute.xlu2 %1040 }
0x1f44   :  { %v1043_v17 = vmul.f32 %v1041_v16, %v1025_v63 }
0x1f46   :  { %1045 = vrot.lane.b32.xlu1 %v1043_v17, %s1318_s19  ;;  %s1062_s19 = sshll.u32 %s1659_s5, 4  ;;  %s1063_s19 = int_to_ptr.hbm [resolvable:$true] %s1062_s19 }
0x1f4b   :  { %v1052_v18 = vpop.permute.xlu2 %1051 }
0x1f4c   :  { %1055 = vst.msk [vmem:[#allocation8 + $0x8] sm:$0xff] %vm133_vm1, %v1052_v18 }
0x1f4d   :  { %1081 = dma.vmem_to_hbm [thread:$0]  %s1074_s21, 256, %s1076_s24, [#allocation9], %s1314_s26, %s1314_s26, %s1315_s27  }
0x1fb8   :  { %v1046_v19 = vpop.permute.xlu1 %1045 }
0x1fb9   :  { %1049 = vst.msk [vmem:[#allocation7 + $0x8] sm:$0xff] %vm133_vm1, %v1046_v19 }
0x1fba   :  { %1068 = dma.vmem_to_hbm [thread:$0]  %s1061_s25, 256, %s1063_s19, [#allocation6], %s1314_s26, %s1314_s26, %s1315_s27  }
0x1fbb   :  { %1309 = dma.done.wait [#allocation6], 256  }
0x1fbc   :  { %1310 = vsyncadd [#allocation6], 4294967040 }
0x1fbd   :  { %1311 = dma.done.wait [#allocation9], 256  }
0x1fbe   :  { %1312 = vsyncadd [#allocation9], 4294967040 }
0x1fbf   :  { %1090 = vsyncpa [#allocation5], 1 }
0x1fc0   :  { %1091 = vsyncpa [#allocation6], 1 }
0x1fc1   :  { %1092 = vsyncpa [#allocation9], 1 }

</bundles_post_ra>
